<compile_context>
chip_gen: v5e
topology: v5e:2x2
jax: 0.10.0
libtpu: 0.0.40
codegen_flags: <defaults>
</compile_context>

<pallas_src>
import functools

import jax
import jax.numpy as jnp
from jax import lax
from jax.experimental import pallas as pl
from jax.experimental.pallas import tpu as pltpu

EPS = 1e-5          # torch.nn.BatchNorm2d default
LANE = 128          # Cout padded to the lane width (lane-dense MXU / stores)
KPAD = 16           # contraction dims padded only to the bf16 sublane pack
NCORES = 2          # leading "parallel" pass-1 axis (2 TCs on v7x)


def _default_vmem_limit():
    """Chip-aware scoped-VMEM limit (raise above 32 MiB where physical allows)."""
    limit = 48 * 1024 * 1024        # safe on v7x (64 MiB) and v5e/v6e (128 MiB)
    try:
        cap = int(pltpu.get_tpu_info().vmem_capacity_bytes)
        limit = max(min(cap * 3 // 4, 100 * 1024 * 1024), 32 * 1024 * 1024)
    except Exception:               # best-effort query; fallback stays safe
        pass
    return limit


VMEM_LIMIT = _default_vmem_limit()


# ------------------------------ small helpers -------------------------------

def _round_up(x, m):
    return (x + m - 1) // m * m


def _pad2(a, rows, cols):
    r, c = a.shape
    return jnp.pad(a, ((0, rows - r), (0, cols - c)))


def _pad_vec(v, n):
    # [C] -> [1, Cp]; zero padding keeps padded channels exactly zero post-BN.
    return jnp.pad(v, (0, n - v.shape[0])).reshape(1, n).astype(jnp.float32)


def _mosaic(sem):
    return pltpu.CompilerParams(dimension_semantics=sem,
                                vmem_limit_bytes=VMEM_LIMIT)


def _choose_tiles(m):
    """Return (tm1 pass-1 tile, steps-per-core, tm2 pass-2 tile, padded rows)."""
    target = max(_round_up(m, 16), 16)
    tm1 = 512
    while tm1 > 16 and tm1 * NCORES > target:
        tm1 //= 2
    mp = _round_up(m, tm1 * NCORES)
    spc = mp // (tm1 * NCORES)
    # Pass 2 is a pure HBM-bound epilogue: use a larger, independent row tile
    # to amortize the per-grid-step overhead, keeping mp % tm2 == 0.
    tm2 = tm1
    while tm2 * 2 <= min(mp, 2048) and mp % (tm2 * 2) == 0:
        tm2 *= 2
    return tm1, spc, tm2, mp


# ----------------------------- Pallas kernels -------------------------------

def _conv_stats_kernel(p_ref, w_ref, y_ref, stats_ref):
    """Pass 1: y = patches @ W (f32 accum); accumulate per-channel sum/sumsq."""
    @pl.when(pl.program_id(1) == 0)
    def _():
        stats_ref[...] = jnp.zeros_like(stats_ref)

    y = jnp.dot(p_ref[...], w_ref[...], preferred_element_type=jnp.float32)
    y_ref[...] = y.astype(y_ref.dtype)            # bf16 writeback (perf review)
    stats_ref[0] += jnp.concatenate(
        [jnp.sum(y, axis=0, keepdims=True),
         jnp.sum(y * y, axis=0, keepdims=True)], axis=0)


def _conv_ds_stats_kernel(p_ref, pd_ref, w_ref, wd_ref, y_ref, stats_ref):
    """Pass 1 (fused downsample): conv2 tile + stats for conv2 and the 1x1 conv."""
    @pl.when(pl.program_id(1) == 0)
    def _():
        stats_ref[...] = jnp.zeros_like(stats_ref)

    y = jnp.dot(p_ref[...], w_ref[...], preferred_element_type=jnp.float32)
    yd = jnp.dot(pd_ref[...], wd_ref[...], preferred_element_type=jnp.float32)
    y_ref[...] = y.astype(y_ref.dtype)
    stats_ref[0] += jnp.concatenate(
        [jnp.sum(y, axis=0, keepdims=True),
         jnp.sum(y * y, axis=0, keepdims=True),
         jnp.sum(yd, axis=0, keepdims=True),
         jnp.sum(yd * yd, axis=0, keepdims=True)], axis=0)


def _bn_moments(stats, row, inv_m):
    # TODO(synk): E[y^2]-mean^2 in f32 cancels when |mean| >> std; a shifted /
    # Welford accumulation would be more robust for training-mode BN.
    mean = stats[row:row + 1, :] * inv_m
    var = jnp.maximum(stats[row + 1:row + 2, :] * inv_m - mean * mean, 0.0)
    return mean, lax.rsqrt(var + EPS)


def _bn_act_kernel(y_ref, stats_ref, g_ref, b_ref, o_ref, *, inv_m, relu):
    """Pass 2: out = BN(y) [+ ReLU]."""
    st = jnp.sum(stats_ref[...], axis=0)          # reduce per-core partials
    mean, rstd = _bn_moments(st, 0, inv_m)
    out = (y_ref[...].astype(jnp.float32) - mean) * rstd * g_ref[...] + b_ref[...]
    if relu:
        out = jnp.maximum(out, 0.0)
    o_ref[...] = out.astype(o_ref.dtype)


def _bn_add_id_kernel(y_ref, id_ref, stats_ref, g_ref, b_ref, o_ref, *, inv_m):
    """Pass 2: out = ReLU(BN(y) + identity)."""
    st = jnp.sum(stats_ref[...], axis=0)
    mean, rstd = _bn_moments(st, 0, inv_m)
    out = (y_ref[...].astype(jnp.float32) - mean) * rstd * g_ref[...] + b_ref[...]
    out = out + id_ref[...].astype(jnp.float32)
    o_ref[...] = jnp.maximum(out, 0.0).astype(o_ref.dtype)


def _bn_add_ds_kernel(y_ref, pd_ref, wd_ref, stats_ref, g_ref, b_ref,
                      gd_ref, bd_ref, o_ref, *, inv_m):
    """Pass 2: out = ReLU(BN(y) + BN(xd @ Wd)); the cheap 1x1 conv is recomputed
    here so the identity never hits HBM as a full [M, Cout] array."""
    st = jnp.sum(stats_ref[...], axis=0)
    mean, rstd = _bn_moments(st, 0, inv_m)
    out = (y_ref[...].astype(jnp.float32) - mean) * rstd * g_ref[...] + b_ref[...]

    yd = jnp.dot(pd_ref[...], wd_ref[...], preferred_element_type=jnp.float32)
    mean_d, rstd_d = _bn_moments(st, 2, inv_m)
    idt = (yd - mean_d) * rstd_d * gd_ref[...] + bd_ref[...]

    o_ref[...] = jnp.maximum(out + idt, 0.0).astype(o_ref.dtype)


# ---------------------------- pallas_call wrappers ---------------------------

def conv_stats(patches, w, tm, spc):
    mp, kp = patches.shape
    coutp = w.shape[1]
    cost = pl.CostEstimate(
        flops=2 * mp * kp * coutp, transcendentals=0,
        bytes_accessed=(mp * kp + kp * coutp + mp * coutp) * 2)
    return pl.pallas_call(
        _conv_stats_kernel,
        out_shape=(jax.ShapeDtypeStruct((mp, coutp), jnp.bfloat16),
                   jax.ShapeDtypeStruct((NCORES, 2, coutp), jnp.float32)),
        grid=(NCORES, spc),
        in_specs=[pl.BlockSpec((tm, kp), lambda c, i: (c * spc + i, 0)),
                  pl.BlockSpec((kp, coutp), lambda c, i: (0, 0))],   # resident W
        out_specs=(pl.BlockSpec((tm, coutp), lambda c, i: (c * spc + i, 0)),
                   pl.BlockSpec((1, 2, coutp), lambda c, i: (c, 0, 0))),
        compiler_params=_mosaic(("parallel", "arbitrary")),
        cost_estimate=cost,
    )(patches, w)


def conv_ds_stats(patches, pd, w, wd, tm, spc):
    mp, kp = patches.shape
    kdp = pd.shape[1]
    coutp = w.shape[1]
    cost = pl.CostEstimate(
        flops=2 * mp * (kp + kdp) * coutp, transcendentals=0,
        bytes_accessed=(mp * (kp + kdp) + (kp + kdp) * coutp + mp * coutp) * 2)
    return pl.pallas_call(
        _conv_ds_stats_kernel,
        out_shape=(jax.ShapeDtypeStruct((mp, coutp), jnp.bfloat16),
                   jax.ShapeDtypeStruct((NCORES, 4, coutp), jnp.float32)),
        grid=(NCORES, spc),
        in_specs=[pl.BlockSpec((tm, kp), lambda c, i: (c * spc + i, 0)),
                  pl.BlockSpec((tm, kdp), lambda c, i: (c * spc + i, 0)),
                  pl.BlockSpec((kp, coutp), lambda c, i: (0, 0)),
                  pl.BlockSpec((kdp, coutp), lambda c, i: (0, 0))],
        out_specs=(pl.BlockSpec((tm, coutp), lambda c, i: (c * spc + i, 0)),
                   pl.BlockSpec((1, 4, coutp), lambda c, i: (c, 0, 0))),
        compiler_params=_mosaic(("parallel", "arbitrary")),
        cost_estimate=cost,
    )(patches, pd, w, wd)


def bn_act(y, stats, g, b, tm, *, inv_m, relu, out_dtype):
    mp, coutp = y.shape
    kern = functools.partial(_bn_act_kernel, inv_m=inv_m, relu=relu)
    return pl.pallas_call(
        kern,
        out_shape=jax.ShapeDtypeStruct((mp, coutp), out_dtype),
        grid=(mp // tm,),
        in_specs=[pl.BlockSpec((tm, coutp), lambda i: (i, 0)),
                  pl.BlockSpec(stats.shape, lambda i: (0, 0, 0)),
                  pl.BlockSpec((1, coutp), lambda i: (0, 0)),
                  pl.BlockSpec((1, coutp), lambda i: (0, 0))],
        out_specs=pl.BlockSpec((tm, coutp), lambda i: (i, 0)),
        compiler_params=_mosaic(("parallel",)),
    )(y, stats, g, b)


def bn_add_id(y, identity, stats, g, b, tm, *, inv_m):
    mp, coutp = y.shape
    kern = functools.partial(_bn_add_id_kernel, inv_m=inv_m)
    return pl.pallas_call(
        kern,
        out_shape=jax.ShapeDtypeStruct((mp, coutp), jnp.bfloat16),
        grid=(mp // tm,),
        in_specs=[pl.BlockSpec((tm, coutp), lambda i: (i, 0)),
                  pl.BlockSpec((tm, coutp), lambda i: (i, 0)),
                  pl.BlockSpec(stats.shape, lambda i: (0, 0, 0)),
                  pl.BlockSpec((1, coutp), lambda i: (0, 0)),
                  pl.BlockSpec((1, coutp), lambda i: (0, 0))],
        out_specs=pl.BlockSpec((tm, coutp), lambda i: (i, 0)),
        compiler_params=_mosaic(("parallel",)),
    )(y, identity, stats, g, b)


def bn_add_ds(y, pd, wd, stats, g, b, gd, bd, tm, *, inv_m):
    mp, coutp = y.shape
    kdp = pd.shape[1]
    kern = functools.partial(_bn_add_ds_kernel, inv_m=inv_m)
    return pl.pallas_call(
        kern,
        out_shape=jax.ShapeDtypeStruct((mp, coutp), jnp.bfloat16),
        grid=(mp // tm,),
        in_specs=[pl.BlockSpec((tm, coutp), lambda i: (i, 0)),
                  pl.BlockSpec((tm, kdp), lambda i: (i, 0)),
                  pl.BlockSpec((kdp, coutp), lambda i: (0, 0)),
                  pl.BlockSpec(stats.shape, lambda i: (0, 0, 0)),
                  pl.BlockSpec((1, coutp), lambda i: (0, 0)),
                  pl.BlockSpec((1, coutp), lambda i: (0, 0)),
                  pl.BlockSpec((1, coutp), lambda i: (0, 0)),
                  pl.BlockSpec((1, coutp), lambda i: (0, 0))],
        out_specs=pl.BlockSpec((tm, coutp), lambda i: (i, 0)),
        compiler_params=_mosaic(("parallel",)),
    )(y, pd, wd, stats, g, b, gd, bd)


# ------------------------------- JAX glue ------------------------------------

def _im2col_3x3_nhwc(x, stride):
    """3x3 / pad=1 im2col on NHWC. Returns [N*Ho*Wo, 9*C], features=(kh,kw,c)."""
    n, h, w, c = x.shape
    xp = jnp.pad(x, ((0, 0), (1, 1), (1, 1), (0, 0)))
    ho = (h + 2 - 3) // stride + 1
    wo = (w + 2 - 3) // stride + 1
    cols = []
    for kh in range(3):
        for kw in range(3):
            cols.append(xp[:, kh:kh + stride * (ho - 1) + 1:stride,
                           kw:kw + stride * (wo - 1) + 1:stride, :])
    p = jnp.concatenate(cols, axis=-1)          # [N, Ho, Wo, 9*C]
    return p.reshape(n * ho * wo, 9 * c)


def _prep_w3x3(w, coutp):
    # [Cout, Cin, 3, 3] -> [(kh,kw,cin), Cout]; K padded to 16, Cout to 128.
    cout, cin = w.shape[0], w.shape[1]
    wf = jnp.transpose(w, (2, 3, 1, 0)).reshape(9 * cin, cout)
    return _pad2(wf, _round_up(9 * cin, KPAD), coutp).astype(jnp.bfloat16)


def _prep_w1x1(w, coutp):
    cout, cin = w.shape[0], w.shape[1]
    wf = w.reshape(cout, cin).T
    return _pad2(wf, _round_up(cin, KPAD), coutp).astype(jnp.bfloat16)


def prepare_params(params):
    """Hoisted once: flatten/transpose/pad weights (bf16) and gamma/beta."""
    cout = params["w1"].shape[0]
    coutp = _round_up(cout, LANE)
    prep = {
        "w1": _prep_w3x3(params["w1"], coutp),
        "g1": _pad_vec(params["g1"], coutp),
        "b1": _pad_vec(params["b1"], coutp),
        "w2": _prep_w3x3(params["w2"], coutp),
        "g2": _pad_vec(params["g2"], coutp),
        "b2": _pad_vec(params["b2"], coutp),
    }
    if params.get("wd") is not None:
        prep["wd"] = _prep_w1x1(params["wd"], coutp)
        prep["gd"] = _pad_vec(params["gd"], coutp)
        prep["bd"] = _pad_vec(params["bd"], coutp)
    return prep


def basic_block_forward(x, prep, *, stride, cout):
    """BasicBlock forward (training-mode BN). x is NCHW f32."""
    n, cin, h, w = x.shape
    coutp = prep["g1"].shape[1]
    x_nhwc = jnp.transpose(x, (0, 2, 3, 1))         # NHWC: channels on lanes

    ho = (h + 2 - 3) // stride + 1
    wo = (w + 2 - 3) // stride + 1
    m = n * ho * wo
    inv_m = 1.0 / m
    tm1, spc, tm2, mp = _choose_tiles(m)

    # conv1 -> bn1 -> relu  (pass 1: matmul + global stats, pass 2: normalize)
    p1 = _im2col_3x3_nhwc(x_nhwc, stride).astype(jnp.bfloat16)
    p1 = _pad2(p1, mp, _round_up(9 * cin, KPAD))
    y1, s1 = conv_stats(p1, prep["w1"], tm1, spc)
    out1 = bn_act(y1, s1, prep["g1"], prep["b1"], tm2,
                  inv_m=inv_m, relu=True, out_dtype=jnp.bfloat16)
    out1_nhwc = out1[:m, :cout].reshape(n, ho, wo, cout)   # bf16, NHWC

    # conv2 patches (stride 1), same M rows as conv1 output.
    # TODO(synk): replace with in-kernel halo-tiled patch construction.
    p2 = _pad2(_im2col_3x3_nhwc(out1_nhwc, 1), mp, _round_up(9 * cout, KPAD))

    if "wd" in prep:
        # downsample identity fused into conv2's two passes (all bf16)
        xd = x_nhwc[:, ::stride, ::stride, :].reshape(m, cin).astype(jnp.bfloat16)
        pd = _pad2(xd, mp, _round_up(cin, KPAD))
        y2, s2 = conv_ds_stats(p2, pd, prep["w2"], prep["wd"], tm1, spc)
        out = bn_add_ds(y2, pd, prep["wd"], s2, prep["g2"], prep["b2"],
                        prep["gd"], prep["bd"], tm2, inv_m=inv_m)
    else:
        assert stride == 1 and cin == cout, \
            "identity path requires stride == 1 and Cin == Cout"
        identity = _pad2(x_nhwc.reshape(m, cin).astype(jnp.bfloat16), mp, coutp)
        y2, s2 = conv_stats(p2, prep["w2"], tm1, spc)
        out = bn_add_id(y2, identity, s2, prep["g2"], prep["b2"], tm2, inv_m=inv_m)

    out = out[:m, :cout].reshape(n, ho, wo, cout)
    # back to NCHW (PyTorch contract); upcast after the cheap bf16 transpose
    return jnp.transpose(out, (0, 3, 1, 2)).astype(jnp.float32)


# --------------------------- pure-JAX reference ------------------------------

def reference_forward(x, params, stride):
    def conv(x, w, s, pad):
        return lax.conv_general_dilated(
            x, w, (s, s), ((pad, pad), (pad, pad)),
            dimension_numbers=("NCHW", "OIHW", "NCHW"))

    def bn(y, g, b):
        mean = y.mean(axis=(0, 2, 3), keepdims=True)
        var = jnp.square(y - mean).mean(axis=(0, 2, 3), keepdims=True)
        return ((y - mean) * lax.rsqrt(var + EPS)
                * g[None, :, None, None] + b[None, :, None, None])

    identity = x
    if params.get("wd") is not None:
        identity = bn(conv(x, params["wd"], stride, 0), params["gd"], params["bd"])
    out = jnp.maximum(bn(conv(x, params["w1"], stride, 1),
                         params["g1"], params["b1"]), 0.0)
    out = bn(conv(out, params["w2"], 1, 1), params["g2"], params["b2"]) + identity
    return jnp.maximum(out, 0.0)


# ---------------------------------- main -------------------------------------

def _run_case(key, n, cin, cout, h, w, stride, max_tol, mean_tol):
    ks = jax.random.split(key, 8)
    x = jax.random.normal(ks[0], (n, cin, h, w), dtype=jnp.float32)
    params = {
        "w1": jax.random.normal(ks[1], (cout, cin, 3, 3), jnp.float32) * 0.1,
        "g1": 1.0 + 0.1 * jax.random.normal(ks[4], (cout,), jnp.float32),
        "b1": 0.1 * jax.random.normal(ks[5], (cout,), jnp.float32),
        "w2": jax.random.normal(ks[2], (cout, cout, 3, 3), jnp.float32) * 0.1,
        "g2": 1.0 + 0.1 * jax.random.normal(ks[6], (cout,), jnp.float32),
        "b2": 0.1 * jax.random.normal(ks[7], (cout,), jnp.float32),
    }
    if stride != 1 or cin != cout:
        params["wd"] = jax.random.normal(ks[3], (cout, cin, 1, 1), jnp.float32) * 0.1
        params["gd"] = jnp.ones((cout,), jnp.float32)
        params["bd"] = jnp.zeros((cout,), jnp.float32)

    prep = prepare_params(params)
    fwd = jax.jit(functools.partial(basic_block_forward, stride=stride, cout=cout))
    out = jax.block_until_ready(fwd(x, prep))
    ref = jax.block_until_ready(reference_forward(x, params, stride))

    ho = (h + 2 - 3) // stride + 1
    wo = (w + 2 - 3) // stride + 1
    assert out.shape == (n, cout, ho, wo), out.shape
    # Tolerances: kernel matmuls use bf16 MXU inputs and bf16 intermediates vs
    # an all-f32 reference; the error grows roughly with sqrt(K)=sqrt(9*C).
    err_max = float(jnp.max(jnp.abs(out - ref)))
    err_mean = float(jnp.mean(jnp.abs(out - ref)))
    cfg = (n, cin, cout, h, w, stride)
    assert err_max < max_tol, f"max abs err {err_max} for case {cfg}"
    assert err_mean < mean_tol, f"mean abs err {err_mean} for case {cfg}"
    return err_max, err_mean


if __name__ == "__main__":
    k1, k2, k3 = jax.random.split(jax.random.PRNGKey(0), 3)

    # config 1: stride-2 block with 1x1-conv downsample, small channels
    _run_case(k1, n=2, cin=4, cout=8, h=16, w=16, stride=2,
              max_tol=0.15, mean_tol=0.02)

    # config 2: stride-1 identity block (no downsample)
    _run_case(k2, n=2, cin=8, cout=8, h=16, w=16, stride=1,
              max_tol=0.15, mean_tol=0.02)

    # config 3: larger-channel config (Cout = 128: lane-exact, no channel pad)
    _run_case(k3, n=2, cin=64, cout=128, h=16, w=16, stride=2,
              max_tol=0.30, mean_tol=0.04)

    print("KERNEL_OK")
</pallas_src>

<mosaic_0001>
module attributes {stable_mosaic.version = 11 : i64} {
  func.func @_bn_act_kernel(%arg0: i32, %arg1: memref<128x128xbf16, #tpu.memory_space<vmem>>, %arg2: memref<2x2x128xf32, #tpu.memory_space<vmem>>, %arg3: memref<1x128xf32, #tpu.memory_space<vmem>>, %arg4: memref<1x128xf32, #tpu.memory_space<vmem>>, %arg5: memref<128x128xbf16, #tpu.memory_space<vmem>>) attributes {dimension_semantics = [#tpu.dimension_semantics<parallel>], iteration_bounds = array<i64: 1>, scalar_prefetch = 0 : i64, scratch_operands = 0 : i64, tpu.core_type = #tpu.core_type<tc>, window_params = [{transform_indices = @transform_0, window_bounds = array<i64: 128, 128>}, {pipeline_mode = #tpu.pipeline_mode<synchronous>, transform_indices = @transform_1, window_bounds = array<i64: 2, 2, 128>}, {pipeline_mode = #tpu.pipeline_mode<synchronous>, transform_indices = @transform_2, window_bounds = array<i64: 1, 128>}, {pipeline_mode = #tpu.pipeline_mode<synchronous>, transform_indices = @transform_3, window_bounds = array<i64: 1, 128>}, {transform_indices = @transform_4, window_bounds = array<i64: 128, 128>}]} {
    %c0 = arith.constant 0 : index
    %c0_0 = arith.constant 0 : index
    %c0_1 = arith.constant 0 : index
    %0 = vector.load %arg2[%c0, %c0_0, %c0_1] : memref<2x2x128xf32, #tpu.memory_space<vmem>>, vector<2x2x128xf32>
    %cst = arith.constant dense<0.000000e+00> : vector<2x128xf32>
    %1 = vector.multi_reduction <add>, %0, %cst [0] : vector<2x2x128xf32> to vector<2x128xf32>
    %2 = vector.extract_strided_slice %1 {offsets = [0, 0], sizes = [1, 128], strides = [1, 1]} : vector<2x128xf32> to vector<1x128xf32>
    %cst_2 = arith.constant 7.812500e-03 : f32
    %3 = vector.broadcast %cst_2 : f32 to vector<1x128xf32>
    %4 = arith.mulf %2, %3 : vector<1x128xf32>
    %5 = vector.extract_strided_slice %1 {offsets = [1, 0], sizes = [1, 128], strides = [1, 1]} : vector<2x128xf32> to vector<1x128xf32>
    %cst_3 = arith.constant 7.812500e-03 : f32
    %6 = vector.broadcast %cst_3 : f32 to vector<1x128xf32>
    %7 = arith.mulf %5, %6 : vector<1x128xf32>
    %8 = arith.mulf %4, %4 : vector<1x128xf32>
    %9 = arith.subf %7, %8 : vector<1x128xf32>
    %cst_4 = arith.constant 0.000000e+00 : f32
    %10 = vector.broadcast %cst_4 : f32 to vector<1x128xf32>
    %11 = arith.maximumf %9, %10 : vector<1x128xf32>
    %cst_5 = arith.constant 9.99999974E-6 : f32
    %12 = vector.broadcast %cst_5 : f32 to vector<1x128xf32>
    %13 = arith.addf %11, %12 : vector<1x128xf32>
    %14 = math.rsqrt %13 : vector<1x128xf32>
    %c0_6 = arith.constant 0 : index
    %c0_7 = arith.constant 0 : index
    %15 = vector.load %arg1[%c0_6, %c0_7] : memref<128x128xbf16, #tpu.memory_space<vmem>>, vector<128x128xbf16>
    %16 = arith.extf %15 : vector<128x128xbf16> to vector<128x128xf32>
    %17 = vector.broadcast %4 : vector<1x128xf32> to vector<128x128xf32>
    %18 = arith.subf %16, %17 : vector<128x128xf32>
    %19 = vector.broadcast %14 : vector<1x128xf32> to vector<128x128xf32>
    %20 = arith.mulf %18, %19 : vector<128x128xf32>
    %c0_8 = arith.constant 0 : index
    %c0_9 = arith.constant 0 : index
    %21 = vector.load %arg3[%c0_8, %c0_9] : memref<1x128xf32, #tpu.memory_space<vmem>>, vector<1x128xf32>
    %22 = vector.broadcast %21 : vector<1x128xf32> to vector<128x128xf32>
    %23 = arith.mulf %20, %22 : vector<128x128xf32>
    %c0_10 = arith.constant 0 : index
    %c0_11 = arith.constant 0 : index
    %24 = vector.load %arg4[%c0_10, %c0_11] : memref<1x128xf32, #tpu.memory_space<vmem>>, vector<1x128xf32>
    %25 = vector.broadcast %24 : vector<1x128xf32> to vector<128x128xf32>
    %26 = arith.addf %23, %25 : vector<128x128xf32>
    %cst_12 = arith.constant 0.000000e+00 : f32
    %27 = vector.broadcast %cst_12 : f32 to vector<128x128xf32>
    %28 = arith.maximumf %26, %27 : vector<128x128xf32>
    %29 = arith.truncf %28 : vector<128x128xf32> to vector<128x128xbf16>
    %c0_13 = arith.constant 0 : index
    %c0_14 = arith.constant 0 : index
    %30 = vector.load %arg5[%c0_13, %c0_14] : memref<128x128xbf16, #tpu.memory_space<vmem>>, vector<128x128xbf16>
    tpu.vector_store %arg5[%c0_13, %c0_14], %29 {strides = array<i32>} : memref<128x128xbf16, #tpu.memory_space<vmem>>, vector<128x128xbf16>,
    return
  }
  func.func @transform_0(%arg0: i32) -> (i32, i32) {
    %c0_i32 = arith.constant 0 : i32
    %c0_i32_0 = arith.constant 0 : i32
    return %arg0, %c0_i32 : i32, i32
  }
  func.func @transform_1(%arg0: i32) -> (i32, i32, i32) {
    %c0_i32 = arith.constant 0 : i32
    %c0_i32_0 = arith.constant 0 : i32
    %c0_i32_1 = arith.constant 0 : i32
    %c0_i32_2 = arith.constant 0 : i32
    return %c0_i32, %c0_i32_0, %c0_i32_1 : i32, i32, i32
  }
  func.func @transform_2(%arg0: i32) -> (i32, i32) {
    %c0_i32 = arith.constant 0 : i32
    %c0_i32_0 = arith.constant 0 : i32
    %c0_i32_1 = arith.constant 0 : i32
    return %c0_i32, %c0_i32_0 : i32, i32
  }
  func.func @transform_3(%arg0: i32) -> (i32, i32) {
    %c0_i32 = arith.constant 0 : i32
    %c0_i32_0 = arith.constant 0 : i32
    %c0_i32_1 = arith.constant 0 : i32
    return %c0_i32, %c0_i32_0 : i32, i32
  }
  func.func @transform_4(%arg0: i32) -> (i32, i32) {
    %c0_i32 = arith.constant 0 : i32
    %c0_i32_0 = arith.constant 0 : i32
    return %arg0, %c0_i32 : i32, i32
  }
}

module attributes {stable_mosaic.version = 11 : i64} {
  func.func @_conv_stats_kernel(%arg0: i32, %arg1: i32, %arg2: memref<64x48xbf16, #tpu.memory_space<vmem>>, %arg3: memref<48x128xbf16, #tpu.memory_space<vmem>>, %arg4: memref<64x128xbf16, #tpu.memory_space<vmem>>, %arg5: memref<1x2x128xf32, #tpu.memory_space<vmem>>) attributes {dimension_semantics = [#tpu.dimension_semantics<parallel>, #tpu.dimension_semantics<arbitrary>], iteration_bounds = array<i64: 2, 1>, scalar_prefetch = 0 : i64, scratch_operands = 0 : i64, tpu.core_type = #tpu.core_type<tc>, window_params = [{transform_indices = @transform_0, window_bounds = array<i64: 64, 48>}, {pipeline_mode = #tpu.pipeline_mode<synchronous>, transform_indices = @transform_1, window_bounds = array<i64: 48, 128>}, {transform_indices = @transform_2, window_bounds = array<i64: 64, 128>}, {transform_indices = @transform_3, window_bounds = array<i64: 1, 2, 128>}]} {
    %c0_i32 = arith.constant 0 : i32
    %0 = arith.cmpi eq, %arg1, %c0_i32 : i32
    %1 = arith.extui %0 : i1 to i32
    %c0_i32_0 = arith.constant 0 : i32
    %2 = arith.cmpi ne, %1, %c0_i32_0 : i32
    scf.if %2 {
      %cst_14 = arith.constant 0.000000e+00 : f32
      %20 = vector.broadcast %cst_14 : f32 to vector<1x2x128xf32>
      %c0_15 = arith.constant 0 : index
      %c0_16 = arith.constant 0 : index
      %c0_17 = arith.constant 0 : index
      %21 = vector.load %arg5[%c0_15, %c0_16, %c0_17] : memref<1x2x128xf32, #tpu.memory_space<vmem>>, vector<1x2x128xf32>
      tpu.vector_store %arg5[%c0_15, %c0_16, %c0_17], %20 {strides = array<i32>} : memref<1x2x128xf32, #tpu.memory_space<vmem>>, vector<1x2x128xf32>,
    } else {
    }
    %c0 = arith.constant 0 : index
    %c0_1 = arith.constant 0 : index
    %3 = vector.load %arg2[%c0, %c0_1] : memref<64x48xbf16, #tpu.memory_space<vmem>>, vector<64x48xbf16>
    %c0_2 = arith.constant 0 : index
    %c0_3 = arith.constant 0 : index
    %4 = vector.load %arg3[%c0_2, %c0_3] : memref<48x128xbf16, #tpu.memory_space<vmem>>, vector<48x128xbf16>
    %cst = arith.constant dense<0.000000e+00> : vector<64x128xf32>
    %5 = tpu.matmul %3, %4, %cst {dimension_numbers = #tpu.dot_dimension_numbers<[1], [0], [0], [1], [0, 0, 1, 1], [], []>} : vector<64x48xbf16>, vector<48x128xbf16>, vector<64x128xf32> -> vector<64x128xf32>
    %6 = arith.truncf %5 : vector<64x128xf32> to vector<64x128xbf16>
    %c0_4 = arith.constant 0 : index
    %c0_5 = arith.constant 0 : index
    %7 = vector.load %arg4[%c0_4, %c0_5] : memref<64x128xbf16, #tpu.memory_space<vmem>>, vector<64x128xbf16>
    tpu.vector_store %arg4[%c0_4, %c0_5], %6 {strides = array<i32>} : memref<64x128xbf16, #tpu.memory_space<vmem>>, vector<64x128xbf16>,
    %c0_6 = arith.constant 0 : index
    %c0_7 = arith.constant 0 : index
    %c0_8 = arith.constant 0 : index
    %8 = vector.load %arg5[%c0_6, %c0_7, %c0_8] : memref<1x2x128xf32, #tpu.memory_space<vmem>>, vector<1x2x128xf32>
    %9 = vector.shape_cast %8 : vector<1x2x128xf32> to vector<2x128xf32>
    %cst_9 = arith.constant dense<0.000000e+00> : vector<128xf32>
    %10 = vector.multi_reduction <add>, %5, %cst_9 [0] : vector<64x128xf32> to vector<128xf32>
    %11 = vector.shape_cast %10 : vector<128xf32> to vector<1x128xf32>
    %12 = arith.mulf %5, %5 : vector<64x128xf32>
    %cst_10 = arith.constant dense<0.000000e+00> : vector<128xf32>
    %13 = vector.multi_reduction <add>, %12, %cst_10 [0] : vector<64x128xf32> to vector<128xf32>
    %14 = vector.shape_cast %13 : vector<128xf32> to vector<1x128xf32>
    %15 = tpu.concatenate %11, %14 in 0 : vector<1x128xf32>, vector<1x128xf32> -> vector<2x128xf32>
    %16 = arith.addf %9, %15 : vector<2x128xf32>
    %c0_11 = arith.constant 0 : index
    %c0_12 = arith.constant 0 : index
    %c0_13 = arith.constant 0 : index
    %17 = vector.load %arg5[%c0_11, %c0_12, %c0_13] : memref<1x2x128xf32, #tpu.memory_space<vmem>>, vector<1x2x128xf32>
    %18 = vector.shape_cast %17 : vector<1x2x128xf32> to vector<2x128xf32>
    %19 = vector.shape_cast %16 : vector<2x128xf32> to vector<1x2x128xf32>
    tpu.vector_store %arg5[%c0_11, %c0_12, %c0_13], %19 {strides = array<i32>} : memref<1x2x128xf32, #tpu.memory_space<vmem>>, vector<1x2x128xf32>,
    return
  }
  func.func @transform_0(%arg0: i32, %arg1: i32) -> (i32, i32) {
    %c1_i32 = arith.constant 1 : i32
    %0 = arith.muli %arg0, %c1_i32 : i32
    %1 = arith.addi %0, %arg1 : i32
    %c0_i32 = arith.constant 0 : i32
    %c0_i32_0 = arith.constant 0 : i32
    return %1, %c0_i32 : i32, i32
  }
  func.func @transform_1(%arg0: i32, %arg1: i32) -> (i32, i32) {
    %c0_i32 = arith.constant 0 : i32
    %c0_i32_0 = arith.constant 0 : i32
    %c0_i32_1 = arith.constant 0 : i32
    return %c0_i32, %c0_i32_0 : i32, i32
  }
  func.func @transform_2(%arg0: i32, %arg1: i32) -> (i32, i32) {
    %c1_i32 = arith.constant 1 : i32
    %0 = arith.muli %arg0, %c1_i32 : i32
    %1 = arith.addi %0, %arg1 : i32
    %c0_i32 = arith.constant 0 : i32
    %c0_i32_0 = arith.constant 0 : i32
    return %1, %c0_i32 : i32, i32
  }
  func.func @transform_3(%arg0: i32, %arg1: i32) -> (i32, i32, i32) {
    %c0_i32 = arith.constant 0 : i32
    %c0_i32_0 = arith.constant 0 : i32
    %c0_i32_1 = arith.constant 0 : i32
    return %arg0, %c0_i32, %c0_i32_0 : i32, i32, i32
  }
}

module attributes {stable_mosaic.version = 11 : i64} {
  func.func @_bn_add_ds_kernel(%arg0: i32, %arg1: memref<128x128xbf16, #tpu.memory_space<vmem>>, %arg2: memref<128x16xbf16, #tpu.memory_space<vmem>>, %arg3: memref<16x128xbf16, #tpu.memory_space<vmem>>, %arg4: memref<2x4x128xf32, #tpu.memory_space<vmem>>, %arg5: memref<1x128xf32, #tpu.memory_space<vmem>>, %arg6: memref<1x128xf32, #tpu.memory_space<vmem>>, %arg7: memref<1x128xf32, #tpu.memory_space<vmem>>, %arg8: memref<1x128xf32, #tpu.memory_space<vmem>>, %arg9: memref<128x128xbf16, #tpu.memory_space<vmem>>) attributes {dimension_semantics = [#tpu.dimension_semantics<parallel>], iteration_bounds = array<i64: 1>, scalar_prefetch = 0 : i64, scratch_operands = 0 : i64, tpu.core_type = #tpu.core_type<tc>, window_params = [{transform_indices = @transform_0, window_bounds = array<i64: 128, 128>}, {transform_indices = @transform_1, window_bounds = array<i64: 128, 16>}, {pipeline_mode = #tpu.pipeline_mode<synchronous>, transform_indices = @transform_2, window_bounds = array<i64: 16, 128>}, {pipeline_mode = #tpu.pipeline_mode<synchronous>, transform_indices = @transform_3, window_bounds = array<i64: 2, 4, 128>}, {pipeline_mode = #tpu.pipeline_mode<synchronous>, transform_indices = @transform_4, window_bounds = array<i64: 1, 128>}, {pipeline_mode = #tpu.pipeline_mode<synchronous>, transform_indices = @transform_5, window_bounds = array<i64: 1, 128>}, {pipeline_mode = #tpu.pipeline_mode<synchronous>, transform_indices = @transform_6, window_bounds = array<i64: 1, 128>}, {pipeline_mode = #tpu.pipeline_mode<synchronous>, transform_indices = @transform_7, window_bounds = array<i64: 1, 128>}, {transform_indices = @transform_8, window_bounds = array<i64: 128, 128>}]} {
    %c0 = arith.constant 0 : index
    %c0_0 = arith.constant 0 : index
    %c0_1 = arith.constant 0 : index
    %0 = vector.load %arg4[%c0, %c0_0, %c0_1] : memref<2x4x128xf32, #tpu.memory_space<vmem>>, vector<2x4x128xf32>
    %cst = arith.constant dense<0.000000e+00> : vector<4x128xf32>
    %1 = vector.multi_reduction <add>, %0, %cst [0] : vector<2x4x128xf32> to vector<4x128xf32>
    %2 = vector.extract_strided_slice %1 {offsets = [0, 0], sizes = [1, 128], strides = [1, 1]} : vector<4x128xf32> to vector<1x128xf32>
    %cst_2 = arith.constant 7.812500e-03 : f32
    %3 = vector.broadcast %cst_2 : f32 to vector<1x128xf32>
    %4 = arith.mulf %2, %3 : vector<1x128xf32>
    %5 = vector.extract_strided_slice %1 {offsets = [1, 0], sizes = [1, 128], strides = [1, 1]} : vector<4x128xf32> to vector<1x128xf32>
    %cst_3 = arith.constant 7.812500e-03 : f32
    %6 = vector.broadcast %cst_3 : f32 to vector<1x128xf32>
    %7 = arith.mulf %5, %6 : vector<1x128xf32>
    %8 = arith.mulf %4, %4 : vector<1x128xf32>
    %9 = arith.subf %7, %8 : vector<1x128xf32>
    %cst_4 = arith.constant 0.000000e+00 : f32
    %10 = vector.broadcast %cst_4 : f32 to vector<1x128xf32>
    %11 = arith.maximumf %9, %10 : vector<1x128xf32>
    %cst_5 = arith.constant 9.99999974E-6 : f32
    %12 = vector.broadcast %cst_5 : f32 to vector<1x128xf32>
    %13 = arith.addf %11, %12 : vector<1x128xf32>
    %14 = math.rsqrt %13 : vector<1x128xf32>
    %c0_6 = arith.constant 0 : index
    %c0_7 = arith.constant 0 : index
    %15 = vector.load %arg1[%c0_6, %c0_7] : memref<128x128xbf16, #tpu.memory_space<vmem>>, vector<128x128xbf16>
    %16 = arith.extf %15 : vector<128x128xbf16> to vector<128x128xf32>
    %17 = vector.broadcast %4 : vector<1x128xf32> to vector<128x128xf32>
    %18 = arith.subf %16, %17 : vector<128x128xf32>
    %19 = vector.broadcast %14 : vector<1x128xf32> to vector<128x128xf32>
    %20 = arith.mulf %18, %19 : vector<128x128xf32>
    %c0_8 = arith.constant 0 : index
    %c0_9 = arith.constant 0 : index
    %21 = vector.load %arg5[%c0_8, %c0_9] : memref<1x128xf32, #tpu.memory_space<vmem>>, vector<1x128xf32>
    %22 = vector.broadcast %21 : vector<1x128xf32> to vector<128x128xf32>
    %23 = arith.mulf %20, %22 : vector<128x128xf32>
    %c0_10 = arith.constant 0 : index
    %c0_11 = arith.constant 0 : index
    %24 = vector.load %arg6[%c0_10, %c0_11] : memref<1x128xf32, #tpu.memory_space<vmem>>, vector<1x128xf32>
    %25 = vector.broadcast %24 : vector<1x128xf32> to vector<128x128xf32>
    %26 = arith.addf %23, %25 : vector<128x128xf32>
    %c0_12 = arith.constant 0 : index
    %c0_13 = arith.constant 0 : index
    %27 = vector.load %arg2[%c0_12, %c0_13] : memref<128x16xbf16, #tpu.memory_space<vmem>>, vector<128x16xbf16>
    %c0_14 = arith.constant 0 : index
    %c0_15 = arith.constant 0 : index
    %28 = vector.load %arg3[%c0_14, %c0_15] : memref<16x128xbf16, #tpu.memory_space<vmem>>, vector<16x128xbf16>
    %cst_16 = arith.constant dense<0.000000e+00> : vector<128x128xf32>
    %29 = tpu.matmul %27, %28, %cst_16 {dimension_numbers = #tpu.dot_dimension_numbers<[1], [0], [0], [1], [0, 0, 1, 1], [], []>} : vector<128x16xbf16>, vector<16x128xbf16>, vector<128x128xf32> -> vector<128x128xf32>
    %30 = vector.extract_strided_slice %1 {offsets = [2, 0], sizes = [1, 128], strides = [1, 1]} : vector<4x128xf32> to vector<1x128xf32>
    %cst_17 = arith.constant 7.812500e-03 : f32
    %31 = vector.broadcast %cst_17 : f32 to vector<1x128xf32>
    %32 = arith.mulf %30, %31 : vector<1x128xf32>
    %33 = vector.extract_strided_slice %1 {offsets = [3, 0], sizes = [1, 128], strides = [1, 1]} : vector<4x128xf32> to vector<1x128xf32>
    %cst_18 = arith.constant 7.812500e-03 : f32
    %34 = vector.broadcast %cst_18 : f32 to vector<1x128xf32>
    %35 = arith.mulf %33, %34 : vector<1x128xf32>
    %36 = arith.mulf %32, %32 : vector<1x128xf32>
    %37 = arith.subf %35, %36 : vector<1x128xf32>
    %cst_19 = arith.constant 0.000000e+00 : f32
    %38 = vector.broadcast %cst_19 : f32 to vector<1x128xf32>
    %39 = arith.maximumf %37, %38 : vector<1x128xf32>
    %cst_20 = arith.constant 9.99999974E-6 : f32
    %40 = vector.broadcast %cst_20 : f32 to vector<1x128xf32>
    %41 = arith.addf %39, %40 : vector<1x128xf32>
    %42 = math.rsqrt %41 : vector<1x128xf32>
    %43 = vector.broadcast %32 : vector<1x128xf32> to vector<128x128xf32>
    %44 = arith.subf %29, %43 : vector<128x128xf32>
    %45 = vector.broadcast %42 : vector<1x128xf32> to vector<128x128xf32>
    %46 = arith.mulf %44, %45 : vector<128x128xf32>
    %c0_21 = arith.constant 0 : index
    %c0_22 = arith.constant 0 : index
    %47 = vector.load %arg7[%c0_21, %c0_22] : memref<1x128xf32, #tpu.memory_space<vmem>>, vector<1x128xf32>
    %48 = vector.broadcast %47 : vector<1x128xf32> to vector<128x128xf32>
    %49 = arith.mulf %46, %48 : vector<128x128xf32>
    %c0_23 = arith.constant 0 : index
    %c0_24 = arith.constant 0 : index
    %50 = vector.load %arg8[%c0_23, %c0_24] : memref<1x128xf32, #tpu.memory_space<vmem>>, vector<1x128xf32>
    %51 = vector.broadcast %50 : vector<1x128xf32> to vector<128x128xf32>
    %52 = arith.addf %49, %51 : vector<128x128xf32>
    %53 = arith.addf %26, %52 : vector<128x128xf32>
    %cst_25 = arith.constant 0.000000e+00 : f32
    %54 = vector.broadcast %cst_25 : f32 to vector<128x128xf32>
    %55 = arith.maximumf %53, %54 : vector<128x128xf32>
    %56 = arith.truncf %55 : vector<128x128xf32> to vector<128x128xbf16>
    %c0_26 = arith.constant 0 : index
    %c0_27 = arith.constant 0 : index
    %57 = vector.load %arg9[%c0_26, %c0_27] : memref<128x128xbf16, #tpu.memory_space<vmem>>, vector<128x128xbf16>
    tpu.vector_store %arg9[%c0_26, %c0_27], %56 {strides = array<i32>} : memref<128x128xbf16, #tpu.memory_space<vmem>>, vector<128x128xbf16>,
    return
  }
  func.func @transform_0(%arg0: i32) -> (i32, i32) {
    %c0_i32 = arith.constant 0 : i32
    %c0_i32_0 = arith.constant 0 : i32
    return %arg0, %c0_i32 : i32, i32
  }
  func.func @transform_1(%arg0: i32) -> (i32, i32) {
    %c0_i32 = arith.constant 0 : i32
    %c0_i32_0 = arith.constant 0 : i32
    return %arg0, %c0_i32 : i32, i32
  }
  func.func @transform_2(%arg0: i32) -> (i32, i32) {
    %c0_i32 = arith.constant 0 : i32
    %c0_i32_0 = arith.constant 0 : i32
    %c0_i32_1 = arith.constant 0 : i32
    return %c0_i32, %c0_i32_0 : i32, i32
  }
  func.func @transform_3(%arg0: i32) -> (i32, i32, i32) {
    %c0_i32 = arith.constant 0 : i32
    %c0_i32_0 = arith.constant 0 : i32
    %c0_i32_1 = arith.constant 0 : i32
    %c0_i32_2 = arith.constant 0 : i32
    return %c0_i32, %c0_i32_0, %c0_i32_1 : i32, i32, i32
  }
  func.func @transform_4(%arg0: i32) -> (i32, i32) {
    %c0_i32 = arith.constant 0 : i32
    %c0_i32_0 = arith.constant 0 : i32
    %c0_i32_1 = arith.constant 0 : i32
    return %c0_i32, %c0_i32_0 : i32, i32
  }
  func.func @transform_5(%arg0: i32) -> (i32, i32) {
    %c0_i32 = arith.constant 0 : i32
    %c0_i32_0 = arith.constant 0 : i32
    %c0_i32_1 = arith.constant 0 : i32
    return %c0_i32, %c0_i32_0 : i32, i32
  }
  func.func @transform_6(%arg0: i32) -> (i32, i32) {
    %c0_i32 = arith.constant 0 : i32
    %c0_i32_0 = arith.constant 0 : i32
    %c0_i32_1 = arith.constant 0 : i32
    return %c0_i32, %c0_i32_0 : i32, i32
  }
  func.func @transform_7(%arg0: i32) -> (i32, i32) {
    %c0_i32 = arith.constant 0 : i32
    %c0_i32_0 = arith.constant 0 : i32
    %c0_i32_1 = arith.constant 0 : i32
    return %c0_i32, %c0_i32_0 : i32, i32
  }
  func.func @transform_8(%arg0: i32) -> (i32, i32) {
    %c0_i32 = arith.constant 0 : i32
    %c0_i32_0 = arith.constant 0 : i32
    return %arg0, %c0_i32 : i32, i32
  }
}

module attributes {stable_mosaic.version = 11 : i64} {
  func.func @_conv_ds_stats_kernel(%arg0: i32, %arg1: i32, %arg2: memref<64x80xbf16, #tpu.memory_space<vmem>>, %arg3: memref<64x16xbf16, #tpu.memory_space<vmem>>, %arg4: memref<80x128xbf16, #tpu.memory_space<vmem>>, %arg5: memref<16x128xbf16, #tpu.memory_space<vmem>>, %arg6: memref<64x128xbf16, #tpu.memory_space<vmem>>, %arg7: memref<1x4x128xf32, #tpu.memory_space<vmem>>) attributes {dimension_semantics = [#tpu.dimension_semantics<parallel>, #tpu.dimension_semantics<arbitrary>], iteration_bounds = array<i64: 2, 1>, scalar_prefetch = 0 : i64, scratch_operands = 0 : i64, tpu.core_type = #tpu.core_type<tc>, window_params = [{transform_indices = @transform_0, window_bounds = array<i64: 64, 80>}, {transform_indices = @transform_1, window_bounds = array<i64: 64, 16>}, {pipeline_mode = #tpu.pipeline_mode<synchronous>, transform_indices = @transform_2, window_bounds = array<i64: 80, 128>}, {pipeline_mode = #tpu.pipeline_mode<synchronous>, transform_indices = @transform_3, window_bounds = array<i64: 16, 128>}, {transform_indices = @transform_4, window_bounds = array<i64: 64, 128>}, {transform_indices = @transform_5, window_bounds = array<i64: 1, 4, 128>}]} {
    %c0_i32 = arith.constant 0 : i32
    %0 = arith.cmpi eq, %arg1, %c0_i32 : i32
    %1 = arith.extui %0 : i1 to i32
    %c0_i32_0 = arith.constant 0 : i32
    %2 = arith.cmpi ne, %1, %c0_i32_0 : i32
    scf.if %2 {
      %cst_21 = arith.constant 0.000000e+00 : f32
      %28 = vector.broadcast %cst_21 : f32 to vector<1x4x128xf32>
      %c0_22 = arith.constant 0 : index
      %c0_23 = arith.constant 0 : index
      %c0_24 = arith.constant 0 : index
      %29 = vector.load %arg7[%c0_22, %c0_23, %c0_24] : memref<1x4x128xf32, #tpu.memory_space<vmem>>, vector<1x4x128xf32>
      tpu.vector_store %arg7[%c0_22, %c0_23, %c0_24], %28 {strides = array<i32>} : memref<1x4x128xf32, #tpu.memory_space<vmem>>, vector<1x4x128xf32>,
    } else {
    }
    %c0 = arith.constant 0 : index
    %c0_1 = arith.constant 0 : index
    %3 = vector.load %arg2[%c0, %c0_1] : memref<64x80xbf16, #tpu.memory_space<vmem>>, vector<64x80xbf16>
    %c0_2 = arith.constant 0 : index
    %c0_3 = arith.constant 0 : index
    %4 = vector.load %arg4[%c0_2, %c0_3] : memref<80x128xbf16, #tpu.memory_space<vmem>>, vector<80x128xbf16>
    %cst = arith.constant dense<0.000000e+00> : vector<64x128xf32>
    %5 = tpu.matmul %3, %4, %cst {dimension_numbers = #tpu.dot_dimension_numbers<[1], [0], [0], [1], [0, 0, 1, 1], [], []>} : vector<64x80xbf16>, vector<80x128xbf16>, vector<64x128xf32> -> vector<64x128xf32>
    %c0_4 = arith.constant 0 : index
    %c0_5 = arith.constant 0 : index
    %6 = vector.load %arg3[%c0_4, %c0_5] : memref<64x16xbf16, #tpu.memory_space<vmem>>, vector<64x16xbf16>
    %c0_6 = arith.constant 0 : index
    %c0_7 = arith.constant 0 : index
    %7 = vector.load %arg5[%c0_6, %c0_7] : memref<16x128xbf16, #tpu.memory_space<vmem>>, vector<16x128xbf16>
    %cst_8 = arith.constant dense<0.000000e+00> : vector<64x128xf32>
    %8 = tpu.matmul %6, %7, %cst_8 {dimension_numbers = #tpu.dot_dimension_numbers<[1], [0], [0], [1], [0, 0, 1, 1], [], []>} : vector<64x16xbf16>, vector<16x128xbf16>, vector<64x128xf32> -> vector<64x128xf32>
    %9 = arith.truncf %5 : vector<64x128xf32> to vector<64x128xbf16>
    %c0_9 = arith.constant 0 : index
    %c0_10 = arith.constant 0 : index
    %10 = vector.load %arg6[%c0_9, %c0_10] : memref<64x128xbf16, #tpu.memory_space<vmem>>, vector<64x128xbf16>
    tpu.vector_store %arg6[%c0_9, %c0_10], %9 {strides = array<i32>} : memref<64x128xbf16, #tpu.memory_space<vmem>>, vector<64x128xbf16>,
    %c0_11 = arith.constant 0 : index
    %c0_12 = arith.constant 0 : index
    %c0_13 = arith.constant 0 : index
    %11 = vector.load %arg7[%c0_11, %c0_12, %c0_13] : memref<1x4x128xf32, #tpu.memory_space<vmem>>, vector<1x4x128xf32>
    %12 = vector.shape_cast %11 : vector<1x4x128xf32> to vector<4x128xf32>
    %cst_14 = arith.constant dense<0.000000e+00> : vector<128xf32>
    %13 = vector.multi_reduction <add>, %5, %cst_14 [0] : vector<64x128xf32> to vector<128xf32>
    %14 = vector.shape_cast %13 : vector<128xf32> to vector<1x128xf32>
    %15 = arith.mulf %5, %5 : vector<64x128xf32>
    %cst_15 = arith.constant dense<0.000000e+00> : vector<128xf32>
    %16 = vector.multi_reduction <add>, %15, %cst_15 [0] : vector<64x128xf32> to vector<128xf32>
    %17 = vector.shape_cast %16 : vector<128xf32> to vector<1x128xf32>
    %cst_16 = arith.constant dense<0.000000e+00> : vector<128xf32>
    %18 = vector.multi_reduction <add>, %8, %cst_16 [0] : vector<64x128xf32> to vector<128xf32>
    %19 = vector.shape_cast %18 : vector<128xf32> to vector<1x128xf32>
    %20 = arith.mulf %8, %8 : vector<64x128xf32>
    %cst_17 = arith.constant dense<0.000000e+00> : vector<128xf32>
    %21 = vector.multi_reduction <add>, %20, %cst_17 [0] : vector<64x128xf32> to vector<128xf32>
    %22 = vector.shape_cast %21 : vector<128xf32> to vector<1x128xf32>
    %23 = tpu.concatenate %14, %17, %19, %22 in 0 : vector<1x128xf32>, vector<1x128xf32>, vector<1x128xf32>, vector<1x128xf32> -> vector<4x128xf32>
    %24 = arith.addf %12, %23 : vector<4x128xf32>
    %c0_18 = arith.constant 0 : index
    %c0_19 = arith.constant 0 : index
    %c0_20 = arith.constant 0 : index
    %25 = vector.load %arg7[%c0_18, %c0_19, %c0_20] : memref<1x4x128xf32, #tpu.memory_space<vmem>>, vector<1x4x128xf32>
    %26 = vector.shape_cast %25 : vector<1x4x128xf32> to vector<4x128xf32>
    %27 = vector.shape_cast %24 : vector<4x128xf32> to vector<1x4x128xf32>
    tpu.vector_store %arg7[%c0_18, %c0_19, %c0_20], %27 {strides = array<i32>} : memref<1x4x128xf32, #tpu.memory_space<vmem>>, vector<1x4x128xf32>,
    return
  }
  func.func @transform_0(%arg0: i32, %arg1: i32) -> (i32, i32) {
    %c1_i32 = arith.constant 1 : i32
    %0 = arith.muli %arg0, %c1_i32 : i32
    %1 = arith.addi %0, %arg1 : i32
    %c0_i32 = arith.constant 0 : i32
    %c0_i32_0 = arith.constant 0 : i32
    return %1, %c0_i32 : i32, i32
  }
  func.func @transform_1(%arg0: i32, %arg1: i32) -> (i32, i32) {
    %c1_i32 = arith.constant 1 : i32
    %0 = arith.muli %arg0, %c1_i32 : i32
    %1 = arith.addi %0, %arg1 : i32
    %c0_i32 = arith.constant 0 : i32
    %c0_i32_0 = arith.constant 0 : i32
    return %1, %c0_i32 : i32, i32
  }
  func.func @transform_2(%arg0: i32, %arg1: i32) -> (i32, i32) {
    %c0_i32 = arith.constant 0 : i32
    %c0_i32_0 = arith.constant 0 : i32
    %c0_i32_1 = arith.constant 0 : i32
    return %c0_i32, %c0_i32_0 : i32, i32
  }
  func.func @transform_3(%arg0: i32, %arg1: i32) -> (i32, i32) {
    %c0_i32 = arith.constant 0 : i32
    %c0_i32_0 = arith.constant 0 : i32
    %c0_i32_1 = arith.constant 0 : i32
    return %c0_i32, %c0_i32_0 : i32, i32
  }
  func.func @transform_4(%arg0: i32, %arg1: i32) -> (i32, i32) {
    %c1_i32 = arith.constant 1 : i32
    %0 = arith.muli %arg0, %c1_i32 : i32
    %1 = arith.addi %0, %arg1 : i32
    %c0_i32 = arith.constant 0 : i32
    %c0_i32_0 = arith.constant 0 : i32
    return %1, %c0_i32 : i32, i32
  }
  func.func @transform_5(%arg0: i32, %arg1: i32) -> (i32, i32, i32) {
    %c0_i32 = arith.constant 0 : i32
    %c0_i32_0 = arith.constant 0 : i32
    %c0_i32_1 = arith.constant 0 : i32
    return %arg0, %c0_i32, %c0_i32_0 : i32, i32, i32
  }
}

</mosaic_0001>

<bundles_post_ra>
// kernel: basic_block_forward.5
= control target key start
LH: loop header
LB: loop body
LE: loop exit
PB: predicated region body
PF: predicated region fallthrough
CT: control target
= control target key end

     0   :  { %vm19_vm0 = vcmask 1041408   ;;  %s416_s1 = inlined_call_operand.vmem [shape: f32[2,2,128], index: 1, kind: input, shape index: {}]   ;;  %s417_s2 = inlined_call_operand.vmem [shape: f32[1,128], index: 2, kind: input, shape index: {}]   ;;  %s418_s3 = inlined_call_operand.vmem [shape: f32[1,128], index: 3, kind: input, shape index: {}]   ;;  %s419_s0 = inlined_call_operand.vmem [shape: bf16[128,128], index: 0, kind: input, shape index: {}]   ;;  %s420_s4 = inlined_call_operand.vmem [shape: bf16[128,128], index: 4, kind: output, shape index: {}]  }
   0x1   :  { %v17_v0 = vld [vmem:[%s416_s1] sm:$0x3]  ;;  %v18_v1 = vld [vmem:[%s416_s1 + $0x2] sm:$0x3]  ;;  %v271_v14 = vld [vmem:[%s419_s0 + $0x8] sm:$0xff]  }
   0x2   :  { %v20_v2 = vsel %vm19_vm0, %v17_v0, 0.0  ;;  %v21_v3 = vsel %vm19_vm0, %v18_v1, 0.0  ;;  %v200_v12 = vld [vmem:[%s419_s0] sm:$0xff]   ;;  %v272_v18 = vld [vmem:[%s419_s0 + $0x10] sm:$0xff]   ;;  %v273_v19 = vld [vmem:[%s419_s0 + $0x18] sm:$0xff]   ;;  %v205_v21 = vunpack.c.l.bf16 %v271_v14  ;;  %v206_v24 = vunpack.c.h.bf16 %v271_v14 }
   0x3   :  { %v22_v4 = vadd.f32 %v21_v3, %v20_v2  ;;  %v201_v16 = vunpack.c.l.bf16 %v200_v12  ;;  %v202_v20 = vunpack.c.h.bf16 %v200_v12  ;;  %v274_v22 = vld [vmem:[%s419_s0 + $0x20] sm:$0xff]   ;;  %v275_v25 = vld [vmem:[%s419_s0 + $0x28] sm:$0xff]   ;;  %v276_v26 = vld [vmem:[%s419_s0 + $0x30] sm:$0xff]   ;;  %v209_v27 = vunpack.c.l.bf16 %v272_v18 }
   0x4   :  { %v210_v28 = vunpack.c.h.bf16 %v272_v18  ;;  %v213_v29 = vunpack.c.l.bf16 %v273_v19  ;;  %v214_v30 = vunpack.c.h.bf16 %v273_v19  ;;  %v277_v31 = vld [vmem:[%s419_s0 + $0x38] sm:$0xff]   ;;  %v217_v34 = vunpack.c.l.bf16 %v274_v22  ;;  %v353_v54 = vld [vmem:[%s417_s2] ss:$0 sm:$0xff] }
   0x5   :  { %v23_v5 = vmul.f32 0.0078125, %v22_v4  ;;  %v218_v35 = vunpack.c.h.bf16 %v274_v22  ;;  %v221_v38 = vunpack.c.l.bf16 %v275_v25  ;;  %v222_v39 = vunpack.c.h.bf16 %v275_v25  ;;  %v358_v0 = vld [vmem:[%s418_s3] ss:$0 sm:$0xff] }
   0x6   :  { %v225_v40 = vunpack.c.l.bf16 %v276_v26  ;;  %v226_v42 = vunpack.c.h.bf16 %v276_v26  ;;  %v229_v43 = vunpack.c.l.bf16 %v277_v31  ;;  %v230_v44 = vunpack.c.h.bf16 %v277_v31 }
   0x7   :  { %v24_v6 = vmul.f32 %v23_v5, %v23_v5  ;;  %v73_v17 = vperm.slane %v23_v5, 0 }
   0x9   :  { %v26_v7 = vrot.slane %v24_v6, 7  ;;  %v74_v33 = vsub.f32 %v201_v16, %v73_v17  ;;  %v75_v37 = vsub.f32 %v202_v20, %v73_v17  ;;  %v76_v45 = vsub.f32 %v205_v21, %v73_v17 }
   0xa   :  { %v77_v46 = vsub.f32 %v206_v24, %v73_v17  ;;  %v78_v47 = vsub.f32 %v209_v27, %v73_v17  ;;  %v79_v48 = vsub.f32 %v210_v28, %v73_v17  ;;  %v80_v50 = vsub.f32 %v213_v29, %v73_v17 }
   0xb   :  { %v28_v8 = vsub.f32 %v23_v5, %v26_v7  ;;  %v81_v51 = vsub.f32 %v214_v30, %v73_v17  ;;  %v82_v52 = vsub.f32 %v217_v34, %v73_v17  ;;  %v83_v55 = vsub.f32 %v218_v35, %v73_v17 }
   0xc   :  { %v84_v56 = vsub.f32 %v221_v38, %v73_v17  ;;  %v85_v57 = vsub.f32 %v222_v39, %v73_v17  ;;  %v86_v58 = vsub.f32 %v225_v40, %v73_v17  ;;  %v87_v59 = vsub.f32 %v226_v42, %v73_v17 }
   0xd   :  { %v29_v9 = vmax.f32 %v28_v8, 0.0  ;;  %v88_v60 = vsub.f32 %v229_v43, %v73_v17  ;;  %v89_v61 = vsub.f32 %v230_v44, %v73_v17 }
   0xf   :  { %v30_v10 = vadd.f32 1e-05, %v29_v9 }
  0x11   :  { %287 = vrsqrt.f32 %v30_v10  ;;  %vm37_vm1 = vweird.f32 %v30_v10 }
  0x17   :  { %v288_v11 = vpop.eup %287 }
  0x18   :  { %v32_v13 = vmul.f32 %v288_v11, %v30_v10  ;;  %vm38_vm2 = vweird.f32 %v288_v11 }
  0x19   :  { %vm344_vm3 = vmor %vm37_vm1, %vm38_vm2 }
  0x1a   :  { %v33_v15 = vmul.f32 %v288_v11, %v32_v13 }
  0x1c   :  { %v34_v23 = vmul.f32 0.5, %v33_v15 }
  0x1e   :  { %v35_v32 = vsub.f32 1.5, %v34_v23 }
  0x20   :  { %v36_v41 = vmul.f32 %v288_v11, %v35_v32 }
  0x22   :  { %v40_v49 = vsel %vm344_vm3, %v288_v11, %v36_v41 }
  0x23   :  { %v90_v53 = vperm.slane %v40_v49, 1 }
  0x25   :  { %v91_v62 = vmul.f32 %v90_v53, %v74_v33  ;;  %v92_v63 = vmul.f32 %v90_v53, %v75_v37  ;;  %v93_v1 = vmul.f32 %v90_v53, %v76_v45  ;;  %v94_v2 = vmul.f32 %v90_v53, %v77_v46 }
  0x26   :  { %v95_v3 = vmul.f32 %v90_v53, %v78_v47  ;;  %v96_v4 = vmul.f32 %v90_v53, %v79_v48  ;;  %v97_v5 = vmul.f32 %v90_v53, %v80_v50  ;;  %v98_v6 = vmul.f32 %v90_v53, %v81_v51 }
  0x27   :  { %v111_v7 = vmul.f32 %v353_v54, %v91_v62  ;;  %v112_v8 = vmul.f32 %v353_v54, %v92_v63  ;;  %v113_v9 = vmul.f32 %v353_v54, %v93_v1  ;;  %v114_v10 = vmul.f32 %v353_v54, %v94_v2 }
  0x28   :  { %v115_v11 = vmul.f32 %v353_v54, %v95_v3  ;;  %v116_v12 = vmul.f32 %v353_v54, %v96_v4  ;;  %v117_v13 = vmul.f32 %v353_v54, %v97_v5  ;;  %v118_v14 = vmul.f32 %v353_v54, %v98_v6 }
  0x29   :  { %v131_v15 = vadd.f32 %v358_v0, %v111_v7  ;;  %v132_v16 = vadd.f32 %v358_v0, %v112_v8  ;;  %v133_v17 = vadd.f32 %v358_v0, %v113_v9  ;;  %v134_v18 = vadd.f32 %v358_v0, %v114_v10 }
  0x2a   :  { %v135_v19 = vadd.f32 %v358_v0, %v115_v11  ;;  %v136_v20 = vadd.f32 %v358_v0, %v116_v12  ;;  %v137_v21 = vadd.f32 %v358_v0, %v117_v13  ;;  %v138_v22 = vadd.f32 %v358_v0, %v118_v14 }
  0x2b   :  { %v147_v23 = vmax.f32 %v131_v15, 0.0  ;;  %v148_v24 = vmax.f32 %v132_v16, 0.0  ;;  %v149_v25 = vmax.f32 %v133_v17, 0.0  ;;  %v150_v26 = vmax.f32 %v134_v18, 0.0 }
  0x2c   :  { %v151_v27 = vmax.f32 %v135_v19, 0.0  ;;  %v152_v28 = vmax.f32 %v136_v20, 0.0  ;;  %v153_v29 = vmax.f32 %v137_v21, 0.0  ;;  %v154_v30 = vmax.f32 %v138_v22, 0.0 }
  0x2d   :  { %v234_v31 = vpack.c.bf16 %v148_v24, %v147_v23  ;;  %v239_v32 = vpack.c.bf16 %v150_v26, %v149_v25  ;;  %v99_v33 = vmul.f32 %v90_v53, %v82_v52  ;;  %v100_v34 = vmul.f32 %v90_v53, %v83_v55 }
  0x2e   :  { %v244_v35 = vpack.c.bf16 %v152_v28, %v151_v27  ;;  %v249_v36 = vpack.c.bf16 %v154_v30, %v153_v29  ;;  %v101_v37 = vmul.f32 %v90_v53, %v84_v56  ;;  %v102_v38 = vmul.f32 %v90_v53, %v85_v57 }
  0x2f   :  { %235 = vst [vmem:[%s420_s4] sm:$0xff] %v234_v31   ;;  %v119_v39 = vmul.f32 %v353_v54, %v99_v33  ;;  %v120_v40 = vmul.f32 %v353_v54, %v100_v34  ;;  %v103_v41 = vmul.f32 %v90_v53, %v86_v58  ;;  %v104_v42 = vmul.f32 %v90_v53, %v87_v59 }
  0x30   :  { %278 = vst [vmem:[%s420_s4 + $0x8] sm:$0xff] %v239_v32   ;;  %v121_v43 = vmul.f32 %v353_v54, %v101_v37  ;;  %v122_v44 = vmul.f32 %v353_v54, %v102_v38  ;;  %v105_v45 = vmul.f32 %v90_v53, %v88_v60  ;;  %v106_v46 = vmul.f32 %v90_v53, %v89_v61 }
  0x31   :  { %279 = vst [vmem:[%s420_s4 + $0x10] sm:$0xff] %v244_v35   ;;  %v139_v47 = vadd.f32 %v358_v0, %v119_v39  ;;  %v140_v48 = vadd.f32 %v358_v0, %v120_v40  ;;  %v123_v49 = vmul.f32 %v353_v54, %v103_v41  ;;  %v124_v50 = vmul.f32 %v353_v54, %v104_v42 }
  0x32   :  { %280 = vst [vmem:[%s420_s4 + $0x18] sm:$0xff] %v249_v36   ;;  %v141_v51 = vadd.f32 %v358_v0, %v121_v43  ;;  %v142_v52 = vadd.f32 %v358_v0, %v122_v44  ;;  %v125_v53 = vmul.f32 %v353_v54, %v105_v45  ;;  %v126_v55 = vmul.f32 %v353_v54, %v106_v46 }
  0x33   :  { %v155_v56 = vmax.f32 %v139_v47, 0.0  ;;  %v156_v57 = vmax.f32 %v140_v48, 0.0  ;;  %v143_v58 = vadd.f32 %v358_v0, %v123_v49  ;;  %v144_v59 = vadd.f32 %v358_v0, %v124_v50 }
  0x34   :  { %v157_v60 = vmax.f32 %v141_v51, 0.0  ;;  %v158_v61 = vmax.f32 %v142_v52, 0.0  ;;  %v145_v62 = vadd.f32 %v358_v0, %v125_v53  ;;  %v146_v63 = vadd.f32 %v358_v0, %v126_v55 }
  0x35   :  { %v254_v1 = vpack.c.bf16 %v156_v57, %v155_v56  ;;  %v159_v2 = vmax.f32 %v143_v58, 0.0  ;;  %v160_v3 = vmax.f32 %v144_v59, 0.0 }
  0x36   :  { %v259_v4 = vpack.c.bf16 %v158_v61, %v157_v60  ;;  %v161_v5 = vmax.f32 %v145_v62, 0.0  ;;  %v162_v6 = vmax.f32 %v146_v63, 0.0 }
  0x37   :  { %281 = vst [vmem:[%s420_s4 + $0x20] sm:$0xff] %v254_v1   ;;  %v264_v54 = vpack.c.bf16 %v160_v3, %v159_v2 }
  0x38   :  { %282 = vst [vmem:[%s420_s4 + $0x28] sm:$0xff] %v259_v4   ;;  %v269_v7 = vpack.c.bf16 %v162_v6, %v161_v5 }
  0x39   :  { %283 = vst [vmem:[%s420_s4 + $0x30] sm:$0xff] %v264_v54  }
  0x3a   :  { %284 = vst [vmem:[%s420_s4 + $0x38] sm:$0xff] %v269_v7  }

// kernel: basic_block_forward.4
= control target key start
LH: loop header
LB: loop body
LE: loop exit
PB: predicated region body
PF: predicated region fallthrough
CT: control target
= control target key end

     0   :  { %s616_s12 = smov 0   ;;  %s618_s13 = smov 0   ;;  %s678_s0 = inlined_call_operand.vmem [shape: bf16[128,48], index: 0, kind: input, shape index: {}]   ;;  %s679_s1 = inlined_call_operand.vmem [shape: bf16[48,128], index: 1, kind: input, shape index: {}]   ;;  %s680_s2 = inlined_call_operand.vmem [shape: bf16[128,128], index: 2, kind: output, shape index: {0}]   ;;  %s681_s3 = inlined_call_operand.vmem [shape: f32[2,2,128], index: 3, kind: output, shape index: {1}]  }
   0x1   :  { %s620_s14 = smov 0  }
   0x2 LB: > { %s26_s15 = sadd.s32 1, %s589_s13  ;;  %p467_p0 = scmp.ge.s32.totalorder %s593_s14, 1  ;;  %s593_s14 = sphi %s620_s14, %s14_s14   ;;  %s589_s13 = sphi %s618_s13, %s683_s13   ;;  %s585_s12 = sphi %s616_s12, %s682_s12  }
   0x3   : > { %p28_p1 = scmp.ge.s32.totalorder %s26_s15, 2  ;;  %p159_p2 = scmp.lt.s32.totalorder %s593_s14, 3 }
   0x5   : > { %s685_s15 = smov (%p28_p1, %s26_s15), 0  ;;  %p160_p3 = pnand %p467_p0, %p159_p2 }
   0x6   : > { %s468_s18 = sshll.u32 (!%p160_p3), %s585_s12, 3  ;;  %p205_p5 = scmp.lt.s32.totalorder (!%p160_p3), %s585_s12, 1 }
   0x7   : > { %163 = sbr.rel (%p160_p3) target bundleno = 190 (0xbe), region = 28  ;;  %p191_p4 = scmp.lt.s32.totalorder (!%p160_p3), %s468_s18, 15 }
   0xc   : > { %v513_v0 = vld [vmem:[%s679_s1 + $0x10] sm:$0xff]  ;;  %v512_v1 = vld [vmem:[%s679_s1 + $0x8] sm:$0xff]  ;;  %s687_s18 = smov (!%p191_p4, %s468_s18), 15  ;;  %v511_v2 = vld [vmem:[%s679_s1] sm:$0xff]  ;;  %vm267_vm0 = vcmask 392192   ;;  %s689_s12 = smov (!%p205_p5, %s585_s12), 1 }
   0xd   : > { %285 = vmatpush.bf16.msra.mxu0 %v513_v0  ;;  %537 = vmatpush.bf16.msra.mxu1 %v513_v0  ;;  %s469_s21 = sshll.u32 %s687_s18, 2  ;;  %s472_s27 = sshll.u32 %s689_s12, 1  ;;  %v595_v7 = vmov 0.0   ;;  %vm360_vm1 = vcmask 1040384  }
   0xe   : > { %538 = vmatpush.bf16.msra.mxu2 %v513_v0  ;;  %539 = vmatpush.bf16.msra.mxu3 %v513_v0  ;;  %s194_s26 = scalar_lea.vmem %s678_s0, %s469_s21  ;;  %s659_s30 = scalar_lea.vmem %s681_s3, %s472_s27 }
   0xf   : > { %v507_v3 = vld [vmem:[%s194_s26] sm:$0xff]  ;;  %v508_v4 = vld [vmem:[%s194_s26 + $0x8] sm:$0xff]  ;;  %v509_v5 = vld [vmem:[%s194_s26 + $0x10] sm:$0xff]  ;;  %214 = vst [vmem:[%s659_s30] sm:$0x3] %v595_v7  ;;  %s202_s6 = scalar_lea.vmem %s680_s2, %s469_s21 }
  0x10   : > { %v510_v6 = vld [vmem:[%s194_s26 + $0x18] sm:$0xff] }
  0x11   : > { %286 = vmatpush.bf16.msra.mxu0 %v512_v1  ;;  %540 = vmatpush.bf16.msra.mxu1 %v512_v1 }
  0x12   : > { %541 = vmatpush.bf16.msra.mxu2 %v512_v1  ;;  %542 = vmatpush.bf16.msra.mxu3 %v512_v1 }
  0x15   : > { %287 = vmatpush.bf16.msra.mxu0 %v511_v2  ;;  %543 = vmatpush.bf16.msra.mxu1 %v511_v2 }
  0x16   : > { %544 = vmatpush.bf16.msra.mxu2 %v511_v2  ;;  %545 = vmatpush.bf16.msra.mxu3 %v511_v2  ;;  %v325_v52 = vld [vmem:[%s659_s30] sm:$0x3] }
  0x18   : > { %501 = vmatmul.msk.bf16.vlgmr.msra.gmra.mxu0 %vm267_vm0, %v507_v3  ;;  %502 = vmatmul.msk.bf16.vlgmr.msra.gmra.mxu1 %vm267_vm0, %v508_v4 }
  0x19   : > { %503 = vmatmul.msk.bf16.vlgmr.msra.gmra.mxu2 %vm267_vm0, %v509_v5  ;;  %504 = vmatmul.msk.bf16.vlgmr.msra.gmra.mxu3 %vm267_vm0, %v510_v6 }
  0x95   : > { %v289_v8 = vpop.f32.mrf.mxu0  ;;  %v294_v9 = vpop.f32.mrf.mxu1 }
  0x96   : > { %v339_v12 = vmul.f32 %v289_v8, %v289_v8  ;;  %v341_v19 = vmul.f32 %v294_v9, %v294_v9 }
  0x9c   : > { %v299_v10 = vpop.f32.mrf.mxu2  ;;  %v304_v11 = vpop.f32.mrf.mxu3 }
  0x9d   : > { %v291_v13 = vpop.f32.mrf.mxu0  ;;  %v296_v14 = vpop.f32.mrf.mxu1  ;;  %v343_v25 = vmul.f32 %v299_v10, %v299_v10  ;;  %v345_v35 = vmul.f32 %v304_v11, %v304_v11 }
  0x9e   : > { %v517_v15 = vpack.c.bf16 %v291_v13, %v289_v8  ;;  %v326_v16 = vadd.f32 %v291_v13, %v289_v8  ;;  %v340_v17 = vmul.f32 %v291_v13, %v291_v13  ;;  %v522_v18 = vpack.c.bf16 %v296_v14, %v294_v9 }
  0x9f   : > { %v342_v23 = vmul.f32 %v296_v14, %v296_v14 }
  0xa0   : > { %518 = vst [vmem:[%s202_s6] sm:$0xff] %v517_v15   ;;  %v347_v20 = vadd.f32 %v340_v17, %v339_v12  ;;  %v327_v21 = vadd.f32 %v326_v16, %v294_v9 }
  0xa1   : > { %534 = vst [vmem:[%s202_s6 + $0x8] sm:$0xff] %v522_v18  }
  0xa2   : > { %v328_v22 = vadd.f32 %v327_v21, %v296_v14  ;;  %v348_v24 = vadd.f32 %v347_v20, %v341_v19 }
  0xa4   : > { %v349_v26 = vadd.f32 %v348_v24, %v342_v23  ;;  %v301_v27 = vpop.f32.mrf.mxu2  ;;  %v329_v28 = vadd.f32 %v328_v22, %v299_v10  ;;  %v306_v29 = vpop.f32.mrf.mxu3 }
  0xa5   : > { %v527_v30 = vpack.c.bf16 %v301_v27, %v299_v10  ;;  %v532_v31 = vpack.c.bf16 %v306_v29, %v304_v11  ;;  %v344_v33 = vmul.f32 %v301_v27, %v301_v27  ;;  %v346_v39 = vmul.f32 %v306_v29, %v306_v29 }
  0xa6   : > { %v330_v32 = vadd.f32 %v329_v28, %v301_v27  ;;  %v350_v34 = vadd.f32 %v349_v26, %v343_v25 }
  0xa7   : > { %535 = vst [vmem:[%s202_s6 + $0x10] sm:$0xff] %v527_v30  }
  0xa8   : > { %v351_v36 = vadd.f32 %v350_v34, %v344_v33  ;;  %536 = vst [vmem:[%s202_s6 + $0x18] sm:$0xff] %v532_v31   ;;  %v331_v37 = vadd.f32 %v330_v32, %v304_v11 }
  0xaa   : > { %v332_v38 = vadd.f32 %v331_v37, %v306_v29  ;;  %v352_v40 = vadd.f32 %v351_v36, %v345_v35 }
  0xac   : > { %v333_v41 = vrot.slane %v332_v38, 4  ;;  %v353_v42 = vadd.f32 %v352_v40, %v346_v39 }
  0xae   : > { %v334_v43 = vadd.f32 %v333_v41, %v332_v38  ;;  %v354_v44 = vrot.slane %v353_v42, 4 }
  0xb0   : > { %v335_v45 = vrot.slane %v334_v43, 2  ;;  %v355_v46 = vadd.f32 %v354_v44, %v353_v42 }
  0xb2   : > { %v336_v47 = vadd.f32 %v335_v45, %v334_v43  ;;  %v356_v48 = vrot.slane %v355_v46, 2 }
  0xb4   : > { %v337_v49 = vrot.slane %v336_v47, 1  ;;  %v357_v50 = vadd.f32 %v356_v48, %v355_v46 }
  0xb6   : > { %v358_v51 = vrot.slane %v357_v50, 1  ;;  %v338_v53 = vadd.f32 %v337_v49, %v336_v47 }
  0xb8   : > { %v359_v54 = vadd.f32 %v358_v51, %v357_v50 }
  0xba   : > { %v361_v55 = vsel %vm360_vm1, %v338_v53, %v359_v54 }
  0xbb   : > { %v362_v56 = vadd.f32 %v361_v55, %v325_v52 }
  0xbd   : > { %363 = vst [vmem:[%s659_s30] sm:$0x3] %v362_v56 }
  0xbe PF: > { %s14_s14 = sadd.s32 1, %s593_s14   ;;  %s682_s12 = smov %s589_s13 }
  0xbf   : > { %p11_p6 = scmp.ge.s32.totalorder %s14_s14, 4   ;;  %s683_s13 = smov %s685_s15 }
  0xc1   :  { %13 = sbr.rel (!%p11_p6) target bundleno = 2 (0x2), region = 74 }

// kernel: basic_block_forward.6
= control target key start
LH: loop header
LB: loop body
LE: loop exit
PB: predicated region body
PF: predicated region fallthrough
CT: control target
= control target key end

     0   :  { %s891_s18 = smov 0   ;;  %s893_s19 = smov 0   ;;  %s973_s0 = inlined_call_operand.vmem [shape: bf16[128,80], index: 0, kind: input, shape index: {}]   ;;  %s974_s1 = inlined_call_operand.vmem [shape: bf16[128,16], index: 1, kind: input, shape index: {}]   ;;  %s975_s2 = inlined_call_operand.vmem [shape: bf16[80,128], index: 2, kind: input, shape index: {}]   ;;  %s976_s3 = inlined_call_operand.vmem [shape: bf16[16,128], index: 3, kind: input, shape index: {}]   ;;  %s977_s4 = inlined_call_operand.vmem [shape: bf16[128,128], index: 4, kind: output, shape index: {0}]   ;;  %s978_s5 = inlined_call_operand.vmem [shape: f32[2,4,128], index: 5, kind: output, shape index: {1}]  }
   0x1   :  { %s895_s20 = smov 0  }
   0x2 LB: > { %s28_s21 = sadd.s32 1, %s854_s19  ;;  %p694_p0 = scmp.ge.s32.totalorder %s858_s20, 1  ;;  %s858_s20 = sphi %s895_s20, %s16_s20   ;;  %s854_s19 = sphi %s893_s19, %s980_s19   ;;  %s850_s18 = sphi %s891_s18, %s979_s18  }
   0x3   : > { %p30_p1 = scmp.ge.s32.totalorder %s28_s21, 2  ;;  %p224_p2 = scmp.lt.s32.totalorder %s858_s20, 3 }
   0x5   : > { %s982_s21 = smov (%p30_p1, %s28_s21), 0  ;;  %p225_p3 = pnand %p694_p0, %p224_p2 }
   0x6   : > { %s695_s26 = sshll.u32 (!%p225_p3), %s850_s18, 3  ;;  %p288_p5 = scmp.lt.s32.totalorder (!%p225_p3), %s850_s18, 1 }
   0x7   : > { %228 = sbr.rel (%p225_p3) target bundleno = 212 (0xd4), region = 36  ;;  %p266_p4 = scmp.lt.s32.totalorder (!%p225_p3), %s695_s26, 15 }
   0xc   : > { %v776_v0 = vld [vmem:[%s975_s2 + $0x20] sm:$0xff]  ;;  %v775_v2 = vld [vmem:[%s975_s2 + $0x18] sm:$0xff]  ;;  %s984_s26 = smov (!%p266_p4, %s695_s26), 15  ;;  %vm444_vm0 = vcmask 130048   ;;  %v774_v3 = vld [vmem:[%s975_s2 + $0x10] sm:$0xff]  ;;  %vm366_vm1 = vcmask 654336  }
   0xd   : > { %v781_v1 = vld [vmem:[%s976_s3] sm:$0xff]  ;;  %382 = vmatpush.bf16.msra.mxu0 %v776_v0  ;;  %805 = vmatpush.bf16.msra.mxu2 %v776_v0  ;;  %s921_s29 = sshll.u32 %s984_s26, 2  ;;  %v773_v6 = vld [vmem:[%s975_s2 + $0x8] sm:$0xff]  ;;  %s986_s18 = smov (!%p288_p5, %s850_s18), 1  ;;  %v860_v22 = vmov 0.0   ;;  %vm571_vm2 = vcmask 1040384  }
   0xe   : > { %464 = vmatpush.bf16.msra.mxu1 %v781_v1  ;;  %810 = vmatpush.bf16.msra.mxu3 %v781_v1  ;;  %s277_s7 = scalar_lea.vmem %s974_s1, %s921_s29  ;;  %v772_v7 = vld [vmem:[%s975_s2] sm:$0xff]  ;;  %s269_s16 = scalar_lea.vmem %s973_s0, %s921_s29  ;;  %vm573_vm3 = vcmask 1041408   ;;  %vm575_vm4 = vcmask 1042432  }
   0xf   : > { %v777_v4 = vld [vmem:[%s277_s7] sm:$0xff]  ;;  %v778_v5 = vld [vmem:[%s277_s7 + $0x8] sm:$0xff]  ;;  %v770_v9 = vld [vmem:[%s269_s16 + $0x10] sm:$0xff]  ;;  %s701_s17 = sshll.u32 %s986_s18, 2  ;;  %s950_s24 = scalar_lea.vmem %s977_s4, %s921_s29 }
  0x10   : > { %v768_v8 = vld [vmem:[%s269_s16] sm:$0xff]  ;;  %v779_v10 = vld [vmem:[%s277_s7 + $0x10] sm:$0xff]  ;;  %v769_v11 = vld [vmem:[%s269_s16 + $0x8] sm:$0xff]  ;;  %s955_s27 = scalar_lea.vmem %s978_s5, %s701_s17 }
  0x11   : > { %383 = vmatpush.bf16.msra.mxu0 %v775_v2  ;;  %806 = vmatpush.bf16.msra.mxu2 %v775_v2  ;;  %v771_v12 = vld [vmem:[%s269_s16 + $0x18] sm:$0xff]  ;;  %297 = vst [vmem:[%s955_s27] sm:$0xf] %v860_v22 }
  0x12   : > { %762 = vmatmul.msk.bf16.vlgmr.msra.gmra.mxu1 %vm444_vm0, %v777_v4  ;;  %763 = vmatmul.msk.bf16.vlgmr.msra.gmra.mxu3 %vm444_vm0, %v778_v5  ;;  %v780_v13 = vld [vmem:[%s277_s7 + $0x18] sm:$0xff] }
  0x15   : > { %384 = vmatpush.bf16.msra.mxu0 %v774_v3  ;;  %807 = vmatpush.bf16.msra.mxu2 %v774_v3 }
  0x19   : > { %385 = vmatpush.bf16.msra.mxu0 %v773_v6  ;;  %808 = vmatpush.bf16.msra.mxu2 %v773_v6 }
  0x1d   : > { %386 = vmatpush.bf16.msra.mxu0 %v772_v7  ;;  %809 = vmatpush.bf16.msra.mxu2 %v772_v7 }
  0x20   : > { %738 = vmatmul.msk.bf16.vlgmr.msra.gmra.mxu0 %vm366_vm1, %v768_v8  ;;  %740 = vmatmul.msk.bf16.vlgmr.msra.gmra.mxu2 %vm366_vm1, %v770_v9 }
  0x22   : > { %764 = vmatmul.msk.bf16.gmra.mxu3 %vm444_vm0, %v779_v10 }
  0x30   : > { %739 = vmatmul.msk.bf16.gmra.mxu0 %vm366_vm1, %v769_v11  ;;  %741 = vmatmul.msk.bf16.gmra.mxu2 %vm366_vm1, %v771_v12 }
  0x32   : > { %765 = vmatmul.msk.bf16.gmra.mxu3 %vm444_vm0, %v780_v13 }
  0x8f   : > { %v466_v17 = vpop.f32.mrf.mxu1 }
  0x90   : > { %v550_v27 = vmul.f32 %v466_v17, %v466_v17 }
  0x95   : > { %v471_v14 = vpop.f32.mrf.mxu3 }
  0x96   : > { %v552_v39 = vmul.f32 %v471_v14, %v471_v14 }
  0x97   : > { %v468_v24 = vpop.f32.mrf.mxu1 }
  0x98   : > { %v551_v28 = vmul.f32 %v468_v24, %v468_v24  ;;  %v537_v31 = vadd.f32 %v468_v24, %v466_v17 }
  0x9a   : > { %v558_v35 = vadd.f32 %v551_v28, %v550_v27  ;;  %v538_v40 = vadd.f32 %v537_v31, %v471_v14 }
  0x9c   : > { %v559_v47 = vadd.f32 %v558_v35, %v552_v39  ;;  %v502_v39 = vld [vmem:[%s955_s27] sm:$0xf] }
  0x9d   : > { %v388_v15 = vpop.f32.mrf.mxu0  ;;  %v473_v16 = vpop.f32.mrf.mxu3 }
  0x9e   : > { %v516_v32 = vmul.f32 %v388_v15, %v388_v15  ;;  %v553_v41 = vmul.f32 %v473_v16, %v473_v16  ;;  %v539_v48 = vadd.f32 %v538_v40, %v473_v16 }
  0xa0   : > { %v560_v54 = vadd.f32 %v559_v47, %v553_v41 }
  0xa3   : > { %v398_v18 = vpop.f32.mrf.mxu2 }
  0xa4   : > { %v520_v51 = vmul.f32 %v398_v18, %v398_v18 }
  0xa5   : > { %v390_v19 = vpop.f32.mrf.mxu0  ;;  %v476_v21 = vpop.f32.mrf.mxu3 }
  0xa6   : > { %v785_v20 = vpack.c.bf16 %v390_v19, %v388_v15  ;;  %v517_v30 = vmul.f32 %v390_v19, %v390_v19  ;;  %v503_v33 = vadd.f32 %v390_v19, %v388_v15  ;;  %v554_v49 = vmul.f32 %v476_v21, %v476_v21 }
  0xa7   : > { %v540_v55 = vadd.f32 %v539_v48, %v476_v21 }
  0xa8   : > { %786 = vst [vmem:[%s950_s24] sm:$0xff] %v785_v20   ;;  %v524_v37 = vadd.f32 %v517_v30, %v516_v32  ;;  %v561_v60 = vadd.f32 %v560_v54, %v554_v49 }
  0xab   : > { %v400_v23 = vpop.f32.mrf.mxu2 }
  0xac   : > { %v795_v25 = vpack.c.bf16 %v400_v23, %v398_v18  ;;  %v521_v57 = vmul.f32 %v400_v23, %v400_v23 }
  0xad   : > { %v393_v26 = vpop.f32.mrf.mxu0  ;;  %v478_v29 = vpop.f32.mrf.mxu3 }
  0xae   : > { %803 = vst [vmem:[%s950_s24 + $0x10] sm:$0xff] %v795_v25   ;;  %v518_v34 = vmul.f32 %v393_v26, %v393_v26  ;;  %v504_v38 = vadd.f32 %v503_v33, %v393_v26  ;;  %v555_v56 = vmul.f32 %v478_v29, %v478_v29  ;;  %v541_v61 = vadd.f32 %v540_v55, %v478_v29 }
  0xb0   : > { %v525_v43 = vadd.f32 %v524_v37, %v518_v34  ;;  %v562_v4 = vadd.f32 %v561_v60, %v555_v56 }
  0xb3   : > { %v403_v36 = vpop.f32.mrf.mxu2 }
  0xb4   : > { %v522_v0 = vmul.f32 %v403_v36, %v403_v36 }
  0xb5   : > { %v395_v42 = vpop.f32.mrf.mxu0  ;;  %v481_v50 = vpop.f32.mrf.mxu3 }
  0xb6   : > { %v790_v44 = vpack.c.bf16 %v395_v42, %v393_v26  ;;  %v505_v45 = vadd.f32 %v504_v38, %v395_v42  ;;  %v519_v46 = vmul.f32 %v395_v42, %v395_v42  ;;  %v556_v62 = vmul.f32 %v481_v50, %v481_v50 }
  0xb7   : > { %v542_v5 = vadd.f32 %v541_v61, %v481_v50 }
  0xb8   : > { %802 = vst [vmem:[%s950_s24 + $0x8] sm:$0xff] %v790_v44   ;;  %v506_v52 = vadd.f32 %v505_v45, %v398_v18  ;;  %v526_v53 = vadd.f32 %v525_v43, %v519_v46  ;;  %v563_v9 = vadd.f32 %v562_v4, %v556_v62 }
  0xba   : > { %v527_v58 = vadd.f32 %v526_v53, %v520_v51  ;;  %v507_v59 = vadd.f32 %v506_v52, %v400_v23 }
  0xbb   : > { %v405_v63 = vpop.f32.mrf.mxu2 }
  0xbc   : > { %v800_v1 = vpack.c.bf16 %v405_v63, %v403_v36  ;;  %v508_v2 = vadd.f32 %v507_v59, %v403_v36  ;;  %v528_v3 = vadd.f32 %v527_v58, %v521_v57  ;;  %v523_v7 = vmul.f32 %v405_v63, %v405_v63 }
  0xbd   : > { %v483_v10 = vpop.f32.mrf.mxu3 }
  0xbe   : > { %804 = vst [vmem:[%s950_s24 + $0x18] sm:$0xff] %v800_v1   ;;  %v509_v6 = vadd.f32 %v508_v2, %v405_v63  ;;  %v529_v8 = vadd.f32 %v528_v3, %v522_v0  ;;  %v543_v13 = vadd.f32 %v542_v5, %v483_v10  ;;  %v557_v14 = vmul.f32 %v483_v10, %v483_v10 }
  0xc0   : > { %v510_v11 = vrot.slane %v509_v6, 4  ;;  %v530_v12 = vadd.f32 %v529_v8, %v523_v7  ;;  %v544_v17 = vrot.slane %v543_v13, 4  ;;  %v564_v18 = vadd.f32 %v563_v9, %v557_v14 }
  0xc2   : > { %v511_v15 = vadd.f32 %v510_v11, %v509_v6  ;;  %v531_v16 = vrot.slane %v530_v12, 4  ;;  %v545_v21 = vadd.f32 %v544_v17, %v543_v13  ;;  %v565_v22 = vrot.slane %v564_v18, 4 }
  0xc4   : > { %v512_v19 = vrot.slane %v511_v15, 2  ;;  %v532_v20 = vadd.f32 %v531_v16, %v530_v12  ;;  %v546_v25 = vrot.slane %v545_v21, 2  ;;  %v566_v26 = vadd.f32 %v565_v22, %v564_v18 }
  0xc6   : > { %v513_v23 = vadd.f32 %v512_v19, %v511_v15  ;;  %v533_v24 = vrot.slane %v532_v20, 2  ;;  %v547_v29 = vadd.f32 %v546_v25, %v545_v21  ;;  %v567_v30 = vrot.slane %v566_v26, 2 }
  0xc8   : > { %v514_v27 = vrot.slane %v513_v23, 1  ;;  %v534_v28 = vadd.f32 %v533_v24, %v532_v20  ;;  %v548_v32 = vrot.slane %v547_v29, 1  ;;  %v568_v33 = vadd.f32 %v567_v30, %v566_v26 }
  0xca   : > { %v535_v31 = vrot.slane %v534_v28, 1  ;;  %v515_v34 = vadd.f32 %v514_v27, %v513_v23  ;;  %v549_v36 = vadd.f32 %v548_v32, %v547_v29  ;;  %v569_v37 = vrot.slane %v568_v33, 1 }
  0xcc   : > { %v536_v35 = vadd.f32 %v535_v31, %v534_v28  ;;  %v570_v40 = vadd.f32 %v569_v37, %v568_v33 }
  0xce   : > { %v572_v38 = vsel %vm571_vm2, %v515_v34, %v536_v35 }
  0xcf   : > { %v574_v41 = vsel %vm573_vm3, %v572_v38, %v549_v36 }
  0xd0   : > { %v576_v42 = vsel %vm575_vm4, %v574_v41, %v570_v40 }
  0xd1   : > { %v577_v43 = vadd.f32 %v576_v42, %v502_v39 }
  0xd3   : > { %578 = vst [vmem:[%s955_s27] sm:$0xf] %v577_v43 }
  0xd4 PF: > { %s16_s20 = sadd.s32 1, %s858_s20   ;;  %s979_s18 = smov %s854_s19 }
  0xd5   : > { %p13_p6 = scmp.ge.s32.totalorder %s16_s20, 4   ;;  %s980_s19 = smov %s982_s21 }
  0xd7   :  { %15 = sbr.rel (!%p13_p6) target bundleno = 2 (0x2), region = 85 }

// kernel: basic_block_forward.7
= control target key start
LH: loop header
LB: loop body
LE: loop exit
PB: predicated region body
PF: predicated region fallthrough
CT: control target
= control target key end

     0   :  { %vm32_vm0 = vcmask 1043456   ;;  %vm224_vm1 = vcmask 130048   ;;  %s937_s2 = inlined_call_operand.vmem [shape: bf16[16,128], index: 2, kind: input, shape index: {}]   ;;  %s938_s1 = inlined_call_operand.vmem [shape: bf16[128,16], index: 1, kind: input, shape index: {}]   ;;  %s939_s3 = inlined_call_operand.vmem [shape: f32[2,4,128], index: 3, kind: input, shape index: {}]   ;;  %s940_s4 = inlined_call_operand.vmem [shape: f32[1,128], index: 4, kind: input, shape index: {}]   ;;  %s941_s5 = inlined_call_operand.vmem [shape: f32[1,128], index: 5, kind: input, shape index: {}]   ;;  %s942_s6 = inlined_call_operand.vmem [shape: f32[1,128], index: 6, kind: input, shape index: {}]   ;;  %s943_s7 = inlined_call_operand.vmem [shape: f32[1,128], index: 7, kind: input, shape index: {}]   ;;  %s944_s0 = inlined_call_operand.vmem [shape: bf16[128,128], index: 0, kind: input, shape index: {}]   ;;  %s945_s8 = inlined_call_operand.vmem [shape: bf16[128,128], index: 8, kind: output, shape index: {}]  }
   0x1   :  { %v492_v0 = vld [vmem:[%s937_s2] sm:$0xff]  ;;  %v486_v2 = vld [vmem:[%s938_s1 + $0x10] sm:$0xff]  ;;  %v485_v15 = vld [vmem:[%s938_s1 + $0x8] sm:$0xff] }
   0x2   :  { %v484_v1 = vld [vmem:[%s938_s1] sm:$0xff]  ;;  %256 = vmatpush.bf16.msra.mxu0 %v492_v0  ;;  %579 = vmatpush.bf16.msra.mxu1 %v492_v0  ;;  %v490_v4 = vld [vmem:[%s938_s1 + $0x30] sm:$0xff]  ;;  %v487_v16 = vld [vmem:[%s938_s1 + $0x18] sm:$0xff] }
   0x3   :  { %v488_v3 = vld [vmem:[%s938_s1 + $0x20] sm:$0xff]  ;;  %580 = vmatpush.bf16.msra.mxu2 %v492_v0  ;;  %581 = vmatpush.bf16.msra.mxu3 %v492_v0  ;;  %v489_v18 = vld [vmem:[%s938_s1 + $0x28] sm:$0xff]  ;;  %v491_v19 = vld [vmem:[%s938_s1 + $0x38] sm:$0xff] }
   0x4   :  { %v30_v5 = vld [vmem:[%s939_s3] sm:$0xf]  ;;  %v31_v6 = vld [vmem:[%s939_s3 + $0x4] sm:$0xf]  ;;  %v566_v37 = vld [vmem:[%s944_s0 + $0x10] sm:$0xff]  }
   0x5   :  { %v33_v7 = vsel %vm32_vm0, %v30_v5, 0.0  ;;  %v34_v8 = vsel %vm32_vm0, %v31_v6, 0.0  ;;  %476 = vmatmul.msk.bf16.vlgmr.msra.gmra.mxu0 %vm224_vm1, %v484_v1  ;;  %478 = vmatmul.msk.bf16.vlgmr.msra.gmra.mxu1 %vm224_vm1, %v486_v2  ;;  %v494_v23 = vld [vmem:[%s944_s0] sm:$0xff]   ;;  %v503_v39 = vunpack.c.l.bf16 %v566_v37  ;;  %v570_v41 = vld [vmem:[%s944_s0 + $0x30] sm:$0xff]   ;;  %v504_v46 = vunpack.c.h.bf16 %v566_v37 }
   0x6   :  { %v35_v9 = vadd.f32 %v34_v8, %v33_v7  ;;  %480 = vmatmul.msk.bf16.vlgmr.msra.gmra.mxu2 %vm224_vm1, %v488_v3  ;;  %482 = vmatmul.msk.bf16.vlgmr.msra.gmra.mxu3 %vm224_vm1, %v490_v4  ;;  %v495_v25 = vunpack.c.l.bf16 %v494_v23  ;;  %v694_v32 = vld [vmem:[%s940_s4] ss:$0 sm:$0xff]  ;;  %v519_v42 = vunpack.c.l.bf16 %v570_v41  ;;  %v496_v45 = vunpack.c.h.bf16 %v494_v23 }
   0x7   :  { %v700_v34 = vld [vmem:[%s941_s5] ss:$0 sm:$0xff]  ;;  %v520_v0 = vunpack.c.h.bf16 %v570_v41 }
   0x8   :  { %v658_v10 = vmul.f32 0.0078125, %v35_v9  ;;  %v568_v38 = vld [vmem:[%s944_s0 + $0x20] sm:$0xff]   ;;  %v565_v9 = vld [vmem:[%s944_s0 + $0x8] sm:$0xff]  }
   0x9   :  { %v511_v40 = vunpack.c.l.bf16 %v568_v38  ;;  %v512_v63 = vunpack.c.h.bf16 %v568_v38 }
   0xa   :  { %v37_v11 = vmul.f32 %v658_v10, %v658_v10  ;;  %v683_v26 = vperm.slane %v658_v10, 0 }
   0xc   :  { %v39_v12 = vrot.slane %v37_v11, 7  ;;  %v87_v29 = vsub.f32 %v495_v25, %v683_v26  ;;  %v91_v43 = vsub.f32 %v503_v39, %v683_v26  ;;  %v95_v44 = vsub.f32 %v511_v40, %v683_v26  ;;  %v567_v11 = vld [vmem:[%s944_s0 + $0x18] sm:$0xff]  }
   0xd   :  { %v99_v47 = vsub.f32 %v519_v42, %v683_v26  ;;  %v88_v50 = vsub.f32 %v496_v45, %v683_v26  ;;  %v92_v51 = vsub.f32 %v504_v46, %v683_v26  ;;  %v96_v3 = vsub.f32 %v512_v63, %v683_v26 }
   0xe   :  { %v41_v13 = vsub.f32 %v658_v10, %v39_v12  ;;  %v100_v4 = vsub.f32 %v520_v0, %v683_v26  ;;  %v569_v12 = vld [vmem:[%s944_s0 + $0x28] sm:$0xff]   ;;  %v508_v23 = vunpack.c.h.bf16 %v567_v11 }
  0x10   :  { %v42_v14 = vmax.f32 %v41_v13, 0.0 }
  0x12   :  { %v43_v17 = vadd.f32 1e-05, %v42_v14 }
  0x14   :  { %586 = vrsqrt.f32 %v43_v17  ;;  %vm50_vm2 = vweird.f32 %v43_v17 }
  0x15   :  { %477 = vmatmul.msk.bf16.gmra.mxu0 %vm224_vm1, %v485_v15  ;;  %479 = vmatmul.msk.bf16.gmra.mxu1 %vm224_vm1, %v487_v16  ;;  %v499_v15 = vunpack.c.l.bf16 %v565_v9  ;;  %v507_v16 = vunpack.c.l.bf16 %v567_v11 }
  0x16   :  { %481 = vmatmul.msk.bf16.gmra.mxu2 %vm224_vm1, %v489_v18  ;;  %483 = vmatmul.msk.bf16.gmra.mxu3 %vm224_vm1, %v491_v19  ;;  %v515_v18 = vunpack.c.l.bf16 %v569_v12 }
  0x1a   :  { %v587_v20 = vpop.eup %586 }
  0x1b   :  { %v45_v21 = vmul.f32 %v587_v20, %v43_v17  ;;  %vm51_vm3 = vweird.f32 %v587_v20  ;;  %v571_v17 = vld [vmem:[%s944_s0 + $0x38] sm:$0xff]  }
  0x1c   :  { %vm52_vm4 = vmor %vm50_vm2, %vm51_vm3  ;;  %v523_v19 = vunpack.c.l.bf16 %v571_v17 }
  0x1d   :  { %v46_v22 = vmul.f32 %v587_v20, %v45_v21  ;;  %v93_v21 = vsub.f32 %v507_v16, %v683_v26 }
  0x1e   :  { %v101_v25 = vsub.f32 %v523_v19, %v683_v26 }
  0x1f   :  { %v47_v24 = vmul.f32 0.5, %v46_v22  ;;  %v500_v22 = vunpack.c.h.bf16 %v565_v9 }
  0x21   :  { %v48_v27 = vsub.f32 1.5, %v47_v24  ;;  %v97_v24 = vsub.f32 %v515_v18, %v683_v26 }
  0x23   :  { %v49_v28 = vmul.f32 %v587_v20, %v48_v27 }
  0x25   :  { %v686_v30 = vsel %vm52_vm4, %v587_v20, %v49_v28  ;;  %v89_v20 = vsub.f32 %v499_v15, %v683_v26 }
  0x26   :  { %v689_v31 = vperm.slane %v686_v30, 1 }
  0x28   :  { %v104_v33 = vmul.f32 %v689_v31, %v87_v29  ;;  %v108_v48 = vmul.f32 %v689_v31, %v91_v43  ;;  %v112_v49 = vmul.f32 %v689_v31, %v95_v44  ;;  %v116_v52 = vmul.f32 %v689_v31, %v99_v47 }
  0x29   :  { %v105_v55 = vmul.f32 %v689_v31, %v88_v50  ;;  %v109_v56 = vmul.f32 %v689_v31, %v92_v51  ;;  %v113_v5 = vmul.f32 %v689_v31, %v96_v3  ;;  %v117_v6 = vmul.f32 %v689_v31, %v100_v4 }
  0x2a   :  { %v124_v35 = vmul.f32 %v694_v32, %v104_v33  ;;  %v128_v53 = vmul.f32 %v694_v32, %v108_v48  ;;  %v132_v54 = vmul.f32 %v694_v32, %v112_v49  ;;  %v136_v57 = vmul.f32 %v694_v32, %v116_v52 }
  0x2b   :  { %v125_v60 = vmul.f32 %v694_v32, %v105_v55  ;;  %v129_v61 = vmul.f32 %v694_v32, %v109_v56  ;;  %v133_v7 = vmul.f32 %v694_v32, %v113_v5  ;;  %v137_v8 = vmul.f32 %v694_v32, %v117_v6 }
  0x2c   :  { %v704_v36 = vadd.f32 %v700_v34, %v124_v35  ;;  %v729_v58 = vadd.f32 %v700_v34, %v128_v53  ;;  %v732_v59 = vadd.f32 %v700_v34, %v132_v54  ;;  %v737_v62 = vadd.f32 %v700_v34, %v136_v57 }
  0x2d   :  { %v740_v1 = vadd.f32 %v700_v34, %v125_v60  ;;  %v743_v2 = vadd.f32 %v700_v34, %v129_v61  ;;  %v761_v13 = vadd.f32 %v700_v34, %v133_v7  ;;  %v764_v14 = vadd.f32 %v700_v34, %v137_v8  ;;  %v816_v60 = vld [vmem:[%s942_s6] ss:$0 sm:$0xff] }
  0x2e   :  { %v106_v27 = vmul.f32 %v689_v31, %v89_v20  ;;  %v110_v28 = vmul.f32 %v689_v31, %v93_v21  ;;  %v90_v29 = vsub.f32 %v500_v22, %v683_v26  ;;  %v94_v33 = vsub.f32 %v508_v23, %v683_v26  ;;  %v828_v7 = vld [vmem:[%s943_s7] ss:$0 sm:$0xff] }
  0x2f   :  { %v778_v35 = vperm.slane %v658_v10, 2  ;;  %v114_v37 = vmul.f32 %v689_v31, %v97_v24  ;;  %v118_v38 = vmul.f32 %v689_v31, %v101_v25  ;;  %v787_v43 = vperm.slane %v686_v30, 3 }
  0x30   :  { %v126_v39 = vmul.f32 %v694_v32, %v106_v27  ;;  %v130_v40 = vmul.f32 %v694_v32, %v110_v28  ;;  %v107_v41 = vmul.f32 %v689_v31, %v90_v29  ;;  %v111_v42 = vmul.f32 %v689_v31, %v94_v33 }
  0x31   :  { %v134_v44 = vmul.f32 %v694_v32, %v114_v37  ;;  %v138_v10 = vmul.f32 %v694_v32, %v118_v38  ;;  %v516_v52 = vunpack.c.h.bf16 %v569_v12  ;;  %v524_v53 = vunpack.c.h.bf16 %v571_v17 }
  0x32   :  { %v792_v45 = vadd.f32 %v700_v34, %v126_v39  ;;  %v795_v46 = vadd.f32 %v700_v34, %v130_v40  ;;  %v127_v47 = vmul.f32 %v694_v32, %v107_v41  ;;  %v131_v48 = vmul.f32 %v694_v32, %v111_v42 }
  0x33   :  { %v800_v51 = vadd.f32 %v700_v34, %v134_v44  ;;  %v803_v30 = vadd.f32 %v700_v34, %v138_v10  ;;  %v98_v61 = vsub.f32 %v516_v52, %v683_v26  ;;  %v102_v63 = vsub.f32 %v524_v53, %v683_v26 }
  0x34   :  { %v808_v56 = vadd.f32 %v700_v34, %v127_v47  ;;  %v811_v57 = vadd.f32 %v700_v34, %v131_v48 }
  0x35   :  { %v115_v4 = vmul.f32 %v689_v31, %v98_v61  ;;  %v119_v5 = vmul.f32 %v689_v31, %v102_v63 }
  0x37   :  { %v135_v9 = vmul.f32 %v694_v32, %v115_v4  ;;  %v139_v26 = vmul.f32 %v694_v32, %v119_v5 }
  0x39   :  { %v836_v18 = vadd.f32 %v700_v34, %v135_v9  ;;  %v839_v19 = vadd.f32 %v700_v34, %v139_v26 }
  0x82   :  { %v258_v49 = vpop.f32.mrf.mxu0  ;;  %v268_v50 = vpop.f32.mrf.mxu1 }
  0x83   :  { %v299_v54 = vsub.f32 %v258_v49, %v778_v35  ;;  %v303_v55 = vsub.f32 %v268_v50, %v778_v35 }
  0x85   :  { %v316_v0 = vmul.f32 %v787_v43, %v299_v54  ;;  %v320_v3 = vmul.f32 %v787_v43, %v303_v55 }
  0x87   :  { %v336_v6 = vmul.f32 %v816_v60, %v316_v0  ;;  %v340_v8 = vmul.f32 %v816_v60, %v320_v3 }
  0x89   :  { %v278_v11 = vpop.f32.mrf.mxu2  ;;  %v288_v12 = vpop.f32.mrf.mxu3  ;;  %v356_v32 = vadd.f32 %v828_v7, %v336_v6  ;;  %v360_v22 = vadd.f32 %v828_v7, %v340_v8 }
  0x8a   :  { %v307_v15 = vsub.f32 %v278_v11, %v778_v35  ;;  %v311_v16 = vsub.f32 %v288_v12, %v778_v35  ;;  %v260_v31 = vpop.f32.mrf.mxu0  ;;  %v270_v17 = vpop.f32.mrf.mxu1 }
  0x8b   :  { %v300_v20 = vsub.f32 %v260_v31, %v778_v35  ;;  %v304_v21 = vsub.f32 %v270_v17, %v778_v35  ;;  %v372_v37 = vadd.f32 %v356_v32, %v704_v36  ;;  %v376_v38 = vadd.f32 %v360_v22, %v729_v58 }
  0x8c   :  { %v324_v23 = vmul.f32 %v787_v43, %v307_v15  ;;  %v328_v24 = vmul.f32 %v787_v43, %v311_v16 }
  0x8d   :  { %v317_v25 = vmul.f32 %v787_v43, %v300_v20  ;;  %v321_v27 = vmul.f32 %v787_v43, %v304_v21  ;;  %v388_v54 = vmax.f32 %v372_v37, 0.0  ;;  %v392_v55 = vmax.f32 %v376_v38, 0.0 }
  0x8e   :  { %v344_v28 = vmul.f32 %v816_v60, %v324_v23  ;;  %v348_v34 = vmul.f32 %v816_v60, %v328_v24 }
  0x8f   :  { %v337_v29 = vmul.f32 %v816_v60, %v317_v25  ;;  %v341_v33 = vmul.f32 %v816_v60, %v321_v27 }
  0x90   :  { %v364_v44 = vadd.f32 %v828_v7, %v344_v28  ;;  %v368_v10 = vadd.f32 %v828_v7, %v348_v34 }
  0x91   :  { %v357_v39 = vadd.f32 %v828_v7, %v337_v29  ;;  %v361_v40 = vadd.f32 %v828_v7, %v341_v33  ;;  %v280_v41 = vpop.f32.mrf.mxu2  ;;  %v290_v42 = vpop.f32.mrf.mxu3 }
  0x92   :  { %v308_v47 = vsub.f32 %v280_v41, %v778_v35  ;;  %v312_v48 = vsub.f32 %v290_v42, %v778_v35  ;;  %v263_v49 = vpop.f32.mrf.mxu0  ;;  %v273_v50 = vpop.f32.mrf.mxu1  ;;  %v380_v6 = vadd.f32 %v364_v44, %v732_v59  ;;  %v384_v8 = vadd.f32 %v368_v10, %v737_v62 }
  0x93   :  { %v373_v36 = vadd.f32 %v357_v39, %v740_v1  ;;  %v377_v58 = vadd.f32 %v361_v40, %v743_v2  ;;  %v301_v52 = vsub.f32 %v263_v49, %v778_v35  ;;  %v305_v53 = vsub.f32 %v273_v50, %v778_v35 }
  0x94   :  { %v325_v61 = vmul.f32 %v787_v43, %v308_v47  ;;  %v329_v63 = vmul.f32 %v787_v43, %v312_v48  ;;  %v396_v23 = vmax.f32 %v380_v6, 0.0  ;;  %v400_v24 = vmax.f32 %v384_v8, 0.0 }
  0x95   :  { %v389_v0 = vmax.f32 %v373_v36, 0.0  ;;  %v393_v3 = vmax.f32 %v377_v58, 0.0  ;;  %v318_v4 = vmul.f32 %v787_v43, %v301_v52  ;;  %v322_v5 = vmul.f32 %v787_v43, %v305_v53 }
  0x96   :  { %v345_v1 = vmul.f32 %v816_v60, %v325_v61  ;;  %v349_v2 = vmul.f32 %v816_v60, %v329_v63 }
  0x97   :  { %v528_v9 = vpack.c.bf16 %v389_v0, %v388_v54  ;;  %v538_v26 = vpack.c.bf16 %v393_v3, %v392_v55  ;;  %v338_v15 = vmul.f32 %v816_v60, %v318_v4  ;;  %v342_v16 = vmul.f32 %v816_v60, %v322_v5 }
  0x98   :  { %v365_v11 = vadd.f32 %v828_v7, %v345_v1  ;;  %v369_v12 = vadd.f32 %v828_v7, %v349_v2 }
  0x99   :  { %529 = vst [vmem:[%s945_s8] sm:$0xff] %v528_v9   ;;  %v283_v31 = vpop.f32.mrf.mxu2  ;;  %v293_v17 = vpop.f32.mrf.mxu3  ;;  %v362_v33 = vadd.f32 %v828_v7, %v342_v16 }
  0x9a   :  { %573 = vst [vmem:[%s945_s8 + $0x10] sm:$0xff] %v538_v26   ;;  %v381_v59 = vadd.f32 %v365_v11, %v761_v13  ;;  %v385_v62 = vadd.f32 %v369_v12, %v764_v14  ;;  %v309_v20 = vsub.f32 %v283_v31, %v778_v35  ;;  %v313_v21 = vsub.f32 %v293_v17, %v778_v35  ;;  %v265_v32 = vpop.f32.mrf.mxu0  ;;  %v275_v22 = vpop.f32.mrf.mxu1 }
  0x9b   :  { %v302_v25 = vsub.f32 %v265_v32, %v778_v35  ;;  %v306_v27 = vsub.f32 %v275_v22, %v778_v35  ;;  %v358_v14 = vadd.f32 %v828_v7, %v338_v15  ;;  %v378_v48 = vadd.f32 %v362_v33, %v795_v46 }
  0x9c   :  { %v397_v28 = vmax.f32 %v381_v59, 0.0  ;;  %v401_v34 = vmax.f32 %v385_v62, 0.0  ;;  %v326_v29 = vmul.f32 %v787_v43, %v309_v20  ;;  %v330_v13 = vmul.f32 %v787_v43, %v313_v21 }
  0x9d   :  { %v319_v37 = vmul.f32 %v787_v43, %v302_v25  ;;  %v323_v38 = vmul.f32 %v787_v43, %v306_v27  ;;  %v374_v47 = vadd.f32 %v358_v14, %v792_v45  ;;  %v394_v3 = vmax.f32 %v378_v48, 0.0 }
  0x9e   :  { %v548_v39 = vpack.c.bf16 %v397_v28, %v396_v23  ;;  %v558_v40 = vpack.c.bf16 %v401_v34, %v400_v24  ;;  %v346_v44 = vmul.f32 %v816_v60, %v326_v29  ;;  %v350_v10 = vmul.f32 %v816_v60, %v330_v13 }
  0x9f   :  { %v339_v41 = vmul.f32 %v816_v60, %v319_v37  ;;  %v343_v42 = vmul.f32 %v816_v60, %v323_v38  ;;  %v390_v0 = vmax.f32 %v374_v47, 0.0 }
  0xa0   :  { %575 = vst [vmem:[%s945_s8 + $0x20] sm:$0xff] %v548_v39   ;;  %v366_v61 = vadd.f32 %v828_v7, %v346_v44  ;;  %v370_v45 = vadd.f32 %v828_v7, %v350_v10 }
  0xa1   :  { %577 = vst [vmem:[%s945_s8 + $0x30] sm:$0xff] %v558_v40   ;;  %v359_v49 = vadd.f32 %v828_v7, %v339_v41  ;;  %v363_v50 = vadd.f32 %v828_v7, %v343_v42  ;;  %v285_v36 = vpop.f32.mrf.mxu2  ;;  %v295_v58 = vpop.f32.mrf.mxu3 }
  0xa2   :  { %v310_v52 = vsub.f32 %v285_v36, %v778_v35  ;;  %v314_v53 = vsub.f32 %v295_v58, %v778_v35  ;;  %v386_v6 = vadd.f32 %v370_v45, %v803_v30 }
  0xa3   :  { %v375_v54 = vadd.f32 %v359_v49, %v808_v56  ;;  %v379_v55 = vadd.f32 %v363_v50, %v811_v57  ;;  %v382_v57 = vadd.f32 %v366_v61, %v800_v51 }
  0xa4   :  { %v327_v46 = vmul.f32 %v787_v43, %v310_v52  ;;  %v331_v63 = vmul.f32 %v787_v43, %v314_v53  ;;  %v402_v51 = vmax.f32 %v386_v6, 0.0 }
  0xa5   :  { %v391_v4 = vmax.f32 %v375_v54, 0.0  ;;  %v395_v5 = vmax.f32 %v379_v55, 0.0  ;;  %v398_v26 = vmax.f32 %v382_v57, 0.0 }
  0xa6   :  { %v347_v1 = vmul.f32 %v816_v60, %v327_v46  ;;  %v351_v35 = vmul.f32 %v816_v60, %v331_v63 }
  0xa7   :  { %v533_v2 = vpack.c.bf16 %v391_v4, %v390_v0  ;;  %v543_v56 = vpack.c.bf16 %v395_v5, %v394_v3 }
  0xa8   :  { %v367_v8 = vadd.f32 %v828_v7, %v347_v1  ;;  %v371_v9 = vadd.f32 %v828_v7, %v351_v35 }
  0xa9   :  { %572 = vst [vmem:[%s945_s8 + $0x8] sm:$0xff] %v533_v2  }
  0xaa   :  { %574 = vst [vmem:[%s945_s8 + $0x18] sm:$0xff] %v543_v56   ;;  %v383_v43 = vadd.f32 %v367_v8, %v836_v18  ;;  %v387_v60 = vadd.f32 %v371_v9, %v839_v19 }
  0xac   :  { %v399_v11 = vmax.f32 %v383_v43, 0.0  ;;  %v403_v30 = vmax.f32 %v387_v60, 0.0 }
  0xae   :  { %v553_v12 = vpack.c.bf16 %v399_v11, %v398_v26  ;;  %v563_v15 = vpack.c.bf16 %v403_v30, %v402_v51 }
  0xb0   :  { %576 = vst [vmem:[%s945_s8 + $0x28] sm:$0xff] %v553_v12  }
  0xb1   :  { %578 = vst [vmem:[%s945_s8 + $0x38] sm:$0xff] %v563_v15  }

</bundles_post_ra>
